<compile_context>
chip_gen: v7x
topology: tpu7x:2x2x1
jax: 0.10.0
libtpu: 0.0.40
codegen_flags: <defaults>
</compile_context>

<pallas_src>
import math

import numpy as np
import jax
import jax.numpy as jnp
from jax.experimental import pallas as pl
from jax.experimental.pallas import tpu as pltpu


# ----------------------------- fused Pallas kernel ------------------------- #

def _simple_cnn_kernel(xe_ref, xo_ref,
                       w1e_ref, w1o_ref, b1_ref,
                       w2e_ref, w2o_ref, b2_ref,
                       fc1w_ref, fc1b_ref, fc2w_ref, fc2b_ref,
                       fc3w_ref, fc3b_ref,
                       o_ref):
    f32 = jnp.float32
    dot = lambda a, b: jnp.dot(a, b, preferred_element_type=f32)

    xe = xe_ref[0]                     # (14, 28)  even input rows 0,2,...,26
    xo = xo_ref[0]                     # (14, 28)  odd  input rows 1,3,...,27

    # ---- conv1 (5x5, 1->6) + ReLU + 2x2 max-pool, fully in registers -------
    # Even conv-output rows 2t use input rows {2t..2t+4}; odd rows 2t+1 use
    # {2t+1..2t+5}.  Via the even/odd input planes these are all contiguous
    # 12-row slices (no strides inside the kernel).
    src_even = (xe[0:12, :], xo[0:12, :], xe[1:13, :], xo[1:13, :], xe[2:14, :])
    src_odd = (xo[0:12, :], xe[1:13, :], xo[1:13, :], xe[2:14, :], xo[2:14, :])

    y_ee = jnp.zeros((12, 72), f32)    # even rows, even output columns
    y_eo = jnp.zeros((12, 72), f32)    # even rows, odd  output columns
    y_oe = jnp.zeros((12, 72), f32)    # odd  rows, even output columns
    y_oo = jnp.zeros((12, 72), f32)    # odd  rows, odd  output columns
    for i in range(5):                 # unrolled kernel-row taps
        we = w1e_ref[i]                # (28, 72): lane w -> lane pw*6+co
        wo = w1o_ref[i]
        y_ee = y_ee + dot(src_even[i], we)
        y_eo = y_eo + dot(src_even[i], wo)
        y_oe = y_oe + dot(src_odd[i], we)
        y_oo = y_oo + dot(src_odd[i], wo)
    win_max = jnp.maximum(jnp.maximum(y_ee, y_eo), jnp.maximum(y_oe, y_oo))
    p1 = jnp.maximum(win_max + b1_ref[...], 0.0)   # (12, 72): [ph, pw*6 + c]

    # ---- conv2 (5x5, 6->16) + ReLU + 2x2 max-pool ---------------------------
    z_e = jnp.zeros((8, 64), f32)      # even output columns
    z_o = jnp.zeros((8, 64), f32)      # odd  output columns
    for i in range(5):
        rows = p1[i:i + 8, :]          # (8, 72) contiguous rows
        z_e = z_e + dot(rows, w2e_ref[i])
        z_o = z_o + dot(rows, w2o_ref[i])
    zc = jnp.maximum(z_e, z_o)         # column-pooled, pre-bias (8, 64)

    # Row-pool + bias + ReLU, feeding straight into fc1 (the PyTorch NCHW
    # flatten order is folded into fc1w: one (64, 120) slab per pooled row q).
    h1 = jnp.zeros((1, 120), f32)
    for q in range(4):
        pr = jnp.maximum(zc[2 * q:2 * q + 1, :], zc[2 * q + 1:2 * q + 2, :])
        p2row = jnp.maximum(pr + b2_ref[...], 0.0)          # (1, 64)
        h1 = h1 + dot(p2row, fc1w_ref[q])
    h1 = jnp.maximum(h1 + fc1b_ref[...], 0.0)               # (1, 120)

    h2 = jnp.maximum(dot(h1, fc2w_ref[...]) + fc2b_ref[...], 0.0)   # (1, 84)
    logits = dot(h2, fc3w_ref[...]) + fc3b_ref[...]                 # (1, 10)
    o_ref[0] = logits


def simple_cnn_forward(packed, x_nchw):
    """Fused forward pass.  x_nchw: (B, 1, 28, 28) f32 -> (B, 10) f32."""
    B = x_nchw.shape[0]
    x = x_nchw.reshape(B, 28, 28)          # squeeze the single input channel
    x_even = x[:, 0::2, :]                 # (B, 14, 28)  tiny host-side glue
    x_odd = x[:, 1::2, :]                  # (B, 14, 28)

    def full(shape):
        return pl.BlockSpec(shape, lambda b: (0,) * len(shape))

    out = pl.pallas_call(
        _simple_cnn_kernel,
        out_shape=jax.ShapeDtypeStruct((B, 1, 10), jnp.float32),
        grid=(B,),
        in_specs=[
            pl.BlockSpec((1, 14, 28), lambda b: (b, 0, 0)),
            pl.BlockSpec((1, 14, 28), lambda b: (b, 0, 0)),
            full((5, 28, 72)), full((5, 28, 72)), full((1, 72)),
            full((5, 72, 64)), full((5, 72, 64)), full((1, 64)),
            full((4, 64, 120)), full((1, 120)),
            full((120, 84)), full((1, 84)),
            full((84, 10)), full((1, 10)),
        ],
        out_specs=pl.BlockSpec((1, 1, 10), lambda b: (b, 0, 0)),
        compiler_params=pltpu.CompilerParams(
            dimension_semantics=("parallel",)),   # shard batch across v7x TCs
    )(x_even, x_odd,
      packed["w1e"], packed["w1o"], packed["b1p"],
      packed["w2e"], packed["w2o"], packed["b2p"],
      packed["fc1w"], packed["fc1b"], packed["fc2w"], packed["fc2b"],
      packed["fc3w"], packed["fc3b"])
    return out.reshape(B, 10)


# --------------------------- host-side param packing ----------------------- #

def pack_params(params):
    """Fold PyTorch-layout params into the kernel's packed/banded layout (once)."""
    w1 = np.asarray(params["conv1_w"], np.float32)   # (6, 1, 5, 5)  (Co,Ci,KH,KW)
    b1 = np.asarray(params["conv1_b"], np.float32)   # (6,)
    w2 = np.asarray(params["conv2_w"], np.float32)   # (16, 6, 5, 5)
    b2 = np.asarray(params["conv2_b"], np.float32)   # (16,)
    f1w = np.asarray(params["fc1_w"], np.float32)    # (120, 256)
    f1b = np.asarray(params["fc1_b"], np.float32)
    f2w = np.asarray(params["fc2_w"], np.float32)    # (84, 120)
    f2b = np.asarray(params["fc2_b"], np.float32)
    f3w = np.asarray(params["fc3_w"], np.float32)    # (10, 84)
    f3b = np.asarray(params["fc3_b"], np.float32)

    C1, C2 = 6, 16
    PW1, PW2 = 12, 4          # pooled widths after conv1 / conv2

    # conv1 banded tap matrices: input lane w (28) -> output lane pw*6+co (72),
    # one matrix per kernel row i and per output-column parity (even / odd).
    w1e = np.zeros((5, 28, PW1 * C1), np.float32)
    w1o = np.zeros((5, 28, PW1 * C1), np.float32)
    for i in range(5):
        for pw in range(PW1):
            for j in range(5):
                for co in range(C1):
                    w1e[i, 2 * pw + j, pw * C1 + co] = w1[co, 0, i, j]
                    w1o[i, 2 * pw + 1 + j, pw * C1 + co] = w1[co, 0, i, j]
    b1p = np.tile(b1, PW1).reshape(1, PW1 * C1)       # lane pw*6+co -> b1[co]

    # conv2 banded tap matrices: input lane w*6+ci (72) -> output lane pw*16+co (64).
    w2e = np.zeros((5, PW1 * C1, PW2 * C2), np.float32)
    w2o = np.zeros((5, PW1 * C1, PW2 * C2), np.float32)
    for i in range(5):
        for pw in range(PW2):
            for j in range(5):
                for ci in range(C1):
                    for co in range(C2):
                        w2e[i, (2 * pw + j) * C1 + ci, pw * C2 + co] = w2[co, ci, i, j]
                        w2o[i, (2 * pw + 1 + j) * C1 + ci, pw * C2 + co] = w2[co, ci, i, j]
    b2p = np.tile(b2, PW2).reshape(1, PW2 * C2)

    # fc1: PyTorch flattens NCHW (B,16,4,4) -> k = co*16 + q*4 + pw.  The kernel
    # feeds pooled row q with lanes packed as pw*16+co, so fold the permutation
    # into one (64, 120) weight slab per q.
    fc1w = np.zeros((4, PW2 * C2, 120), np.float32)
    for q in range(4):
        for pw in range(PW2):
            for co in range(C2):
                fc1w[q, pw * C2 + co, :] = f1w[:, co * 16 + q * 4 + pw]

    to_j = jnp.asarray
    return {
        "w1e": to_j(w1e), "w1o": to_j(w1o), "b1p": to_j(b1p),
        "w2e": to_j(w2e), "w2o": to_j(w2o), "b2p": to_j(b2p),
        "fc1w": to_j(fc1w), "fc1b": to_j(f1b.reshape(1, 120)),
        "fc2w": to_j(np.ascontiguousarray(f2w.T)), "fc2b": to_j(f2b.reshape(1, 84)),
        "fc3w": to_j(np.ascontiguousarray(f3w.T)), "fc3b": to_j(f3b.reshape(1, 10)),
    }


# ------------------------------ init & reference --------------------------- #

def init_params(key):
    """Deterministic init mimicking PyTorch default U(-1/sqrt(fan_in), +...)."""
    def uni(k, shape, fan_in):
        bound = 1.0 / math.sqrt(fan_in)
        return jax.random.uniform(k, shape, jnp.float32, -bound, bound)

    ks = jax.random.split(key, 10)
    return {
        "conv1_w": uni(ks[0], (6, 1, 5, 5), 1 * 5 * 5),
        "conv1_b": uni(ks[1], (6,), 1 * 5 * 5),
        "conv2_w": uni(ks[2], (16, 6, 5, 5), 6 * 5 * 5),
        "conv2_b": uni(ks[3], (16,), 6 * 5 * 5),
        "fc1_w": uni(ks[4], (120, 256), 256),
        "fc1_b": uni(ks[5], (120,), 256),
        "fc2_w": uni(ks[6], (84, 120), 120),
        "fc2_b": uni(ks[7], (84,), 120),
        "fc3_w": uni(ks[8], (10, 84), 84),
        "fc3_b": uni(ks[9], (10,), 84),
    }


def reference_forward(params, x_nchw):
    """Pure-JAX reference with PyTorch semantics (for correctness check)."""
    hi = jax.lax.Precision.HIGHEST
    x = jnp.transpose(x_nchw, (0, 2, 3, 1))                     # NHWC

    def conv_relu(y, w_pt, b):
        w = jnp.transpose(w_pt, (2, 3, 1, 0))                   # HWIO
        y = jax.lax.conv_general_dilated(
            y, w, (1, 1), "VALID",
            dimension_numbers=("NHWC", "HWIO", "NHWC"), precision=hi)
        return jax.nn.relu(y + b)

    def pool(y):
        B, H, W, C = y.shape
        return jnp.max(y.reshape(B, H // 2, 2, W // 2, 2, C), axis=(2, 4))

    x = pool(conv_relu(x, params["conv1_w"], params["conv1_b"]))
    x = pool(conv_relu(x, params["conv2_w"], params["conv2_b"]))
    B = x.shape[0]
    x = jnp.transpose(x, (0, 3, 1, 2)).reshape(B, 16 * 4 * 4)   # NCHW flatten
    mm = lambda a, w, b: jnp.dot(a, w.T, precision=hi) + b
    x = jax.nn.relu(mm(x, params["fc1_w"], params["fc1_b"]))
    x = jax.nn.relu(mm(x, params["fc2_w"], params["fc2_b"]))
    return mm(x, params["fc3_w"], params["fc3_b"])


if __name__ == "__main__":
    key = jax.random.PRNGKey(0)
    pkey, xkey = jax.random.split(key)
    params = init_params(pkey)
    packed = pack_params(params)
    # MNIST-shaped input (28x28 required by the 16*4*4 flatten), small batch.
    x = jax.random.normal(xkey, (2, 1, 28, 28), jnp.float32)

    fwd = jax.jit(simple_cnn_forward)
    out = jax.block_until_ready(fwd(packed, x))
    assert out.shape == (2, 10) and out.dtype == jnp.float32

    ref = jax.block_until_ready(jax.jit(reference_forward)(params, x))
    max_err = float(jnp.max(jnp.abs(out - ref)))
    assert max_err < 1e-2, f"Pallas output mismatch vs reference: {max_err}"
    print("KERNEL_OK")
</pallas_src>

<mosaic_0001>
module attributes {stable_mosaic.version = 11 : i64} {
  func.func @_simple_cnn_kernel(%arg0: i32, %arg1: memref<1x14x28xf32, #tpu.memory_space<vmem>>, %arg2: memref<1x14x28xf32, #tpu.memory_space<vmem>>, %arg3: memref<5x28x72xf32, #tpu.memory_space<vmem>>, %arg4: memref<5x28x72xf32, #tpu.memory_space<vmem>>, %arg5: memref<1x72xf32, #tpu.memory_space<vmem>>, %arg6: memref<5x72x64xf32, #tpu.memory_space<vmem>>, %arg7: memref<5x72x64xf32, #tpu.memory_space<vmem>>, %arg8: memref<1x64xf32, #tpu.memory_space<vmem>>, %arg9: memref<4x64x120xf32, #tpu.memory_space<vmem>>, %arg10: memref<1x120xf32, #tpu.memory_space<vmem>>, %arg11: memref<120x84xf32, #tpu.memory_space<vmem>>, %arg12: memref<1x84xf32, #tpu.memory_space<vmem>>, %arg13: memref<84x10xf32, #tpu.memory_space<vmem>>, %arg14: memref<1x10xf32, #tpu.memory_space<vmem>>, %arg15: memref<1x1x10xf32, #tpu.memory_space<vmem>>) attributes {dimension_semantics = [#tpu.dimension_semantics<parallel>], iteration_bounds = array<i64: 2>, scalar_prefetch = 0 : i64, scratch_operands = 0 : i64, tpu.core_type = #tpu.core_type<tc>, window_params = [{transform_indices = @transform_0, window_bounds = array<i64: 1, 14, 28>}, {transform_indices = @transform_1, window_bounds = array<i64: 1, 14, 28>}, {pipeline_mode = #tpu.pipeline_mode<synchronous>, transform_indices = @transform_2, window_bounds = array<i64: 5, 28, 72>}, {pipeline_mode = #tpu.pipeline_mode<synchronous>, transform_indices = @transform_3, window_bounds = array<i64: 5, 28, 72>}, {pipeline_mode = #tpu.pipeline_mode<synchronous>, transform_indices = @transform_4, window_bounds = array<i64: 1, 72>}, {pipeline_mode = #tpu.pipeline_mode<synchronous>, transform_indices = @transform_5, window_bounds = array<i64: 5, 72, 64>}, {pipeline_mode = #tpu.pipeline_mode<synchronous>, transform_indices = @transform_6, window_bounds = array<i64: 5, 72, 64>}, {pipeline_mode = #tpu.pipeline_mode<synchronous>, transform_indices = @transform_7, window_bounds = array<i64: 1, 64>}, {pipeline_mode = #tpu.pipeline_mode<synchronous>, transform_indices = @transform_8, window_bounds = array<i64: 4, 64, 120>}, {pipeline_mode = #tpu.pipeline_mode<synchronous>, transform_indices = @transform_9, window_bounds = array<i64: 1, 120>}, {pipeline_mode = #tpu.pipeline_mode<synchronous>, transform_indices = @transform_10, window_bounds = array<i64: 120, 84>}, {pipeline_mode = #tpu.pipeline_mode<synchronous>, transform_indices = @transform_11, window_bounds = array<i64: 1, 84>}, {pipeline_mode = #tpu.pipeline_mode<synchronous>, transform_indices = @transform_12, window_bounds = array<i64: 84, 10>}, {pipeline_mode = #tpu.pipeline_mode<synchronous>, transform_indices = @transform_13, window_bounds = array<i64: 1, 10>}, {transform_indices = @transform_14, window_bounds = array<i64: 1, 1, 10>}]} {
    %c0 = arith.constant 0 : index
    %c0_0 = arith.constant 0 : index
    %c0_1 = arith.constant 0 : index
    %0 = vector.load %arg1[%c0, %c0_0, %c0_1] : memref<1x14x28xf32, #tpu.memory_space<vmem>>, vector<1x14x28xf32>
    %1 = vector.shape_cast %0 : vector<1x14x28xf32> to vector<14x28xf32>
    %c0_2 = arith.constant 0 : index
    %c0_3 = arith.constant 0 : index
    %c0_4 = arith.constant 0 : index
    %2 = vector.load %arg2[%c0_2, %c0_3, %c0_4] : memref<1x14x28xf32, #tpu.memory_space<vmem>>, vector<1x14x28xf32>
    %3 = vector.shape_cast %2 : vector<1x14x28xf32> to vector<14x28xf32>
    %4 = vector.extract_strided_slice %1 {offsets = [0, 0], sizes = [12, 28], strides = [1, 1]} : vector<14x28xf32> to vector<12x28xf32>
    %5 = vector.extract_strided_slice %3 {offsets = [0, 0], sizes = [12, 28], strides = [1, 1]} : vector<14x28xf32> to vector<12x28xf32>
    %6 = vector.extract_strided_slice %1 {offsets = [1, 0], sizes = [12, 28], strides = [1, 1]} : vector<14x28xf32> to vector<12x28xf32>
    %7 = vector.extract_strided_slice %3 {offsets = [1, 0], sizes = [12, 28], strides = [1, 1]} : vector<14x28xf32> to vector<12x28xf32>
    %8 = vector.extract_strided_slice %1 {offsets = [2, 0], sizes = [12, 28], strides = [1, 1]} : vector<14x28xf32> to vector<12x28xf32>
    %9 = vector.extract_strided_slice %3 {offsets = [0, 0], sizes = [12, 28], strides = [1, 1]} : vector<14x28xf32> to vector<12x28xf32>
    %10 = vector.extract_strided_slice %1 {offsets = [1, 0], sizes = [12, 28], strides = [1, 1]} : vector<14x28xf32> to vector<12x28xf32>
    %11 = vector.extract_strided_slice %3 {offsets = [1, 0], sizes = [12, 28], strides = [1, 1]} : vector<14x28xf32> to vector<12x28xf32>
    %12 = vector.extract_strided_slice %1 {offsets = [2, 0], sizes = [12, 28], strides = [1, 1]} : vector<14x28xf32> to vector<12x28xf32>
    %13 = vector.extract_strided_slice %3 {offsets = [2, 0], sizes = [12, 28], strides = [1, 1]} : vector<14x28xf32> to vector<12x28xf32>
    %cst = arith.constant 0.000000e+00 : f32
    %14 = vector.broadcast %cst : f32 to vector<12x72xf32>
    %cst_5 = arith.constant 0.000000e+00 : f32
    %15 = vector.broadcast %cst_5 : f32 to vector<12x72xf32>
    %cst_6 = arith.constant 0.000000e+00 : f32
    %16 = vector.broadcast %cst_6 : f32 to vector<12x72xf32>
    %cst_7 = arith.constant 0.000000e+00 : f32
    %17 = vector.broadcast %cst_7 : f32 to vector<12x72xf32>
    %c0_8 = arith.constant 0 : index
    %c0_9 = arith.constant 0 : index
    %c0_10 = arith.constant 0 : index
    %18 = vector.load %arg3[%c0_8, %c0_9, %c0_10] : memref<5x28x72xf32, #tpu.memory_space<vmem>>, vector<1x28x72xf32>
    %19 = vector.shape_cast %18 : vector<1x28x72xf32> to vector<28x72xf32>
    %c0_11 = arith.constant 0 : index
    %c0_12 = arith.constant 0 : index
    %c0_13 = arith.constant 0 : index
    %20 = vector.load %arg4[%c0_11, %c0_12, %c0_13] : memref<5x28x72xf32, #tpu.memory_space<vmem>>, vector<1x28x72xf32>
    %21 = vector.shape_cast %20 : vector<1x28x72xf32> to vector<28x72xf32>
    %cst_14 = arith.constant dense<0.000000e+00> : vector<12x72xf32>
    %22 = tpu.matmul %4, %19, %cst_14 {dimension_numbers = #tpu.dot_dimension_numbers<[1], [0], [0], [1], [0, 0, 1, 1], [], []>} : vector<12x28xf32>, vector<28x72xf32>, vector<12x72xf32> -> vector<12x72xf32>
    %23 = arith.addf %14, %22 : vector<12x72xf32>
    %cst_15 = arith.constant dense<0.000000e+00> : vector<12x72xf32>
    %24 = tpu.matmul %4, %21, %cst_15 {dimension_numbers = #tpu.dot_dimension_numbers<[1], [0], [0], [1], [0, 0, 1, 1], [], []>} : vector<12x28xf32>, vector<28x72xf32>, vector<12x72xf32> -> vector<12x72xf32>
    %25 = arith.addf %15, %24 : vector<12x72xf32>
    %cst_16 = arith.constant dense<0.000000e+00> : vector<12x72xf32>
    %26 = tpu.matmul %9, %19, %cst_16 {dimension_numbers = #tpu.dot_dimension_numbers<[1], [0], [0], [1], [0, 0, 1, 1], [], []>} : vector<12x28xf32>, vector<28x72xf32>, vector<12x72xf32> -> vector<12x72xf32>
    %27 = arith.addf %16, %26 : vector<12x72xf32>
    %cst_17 = arith.constant dense<0.000000e+00> : vector<12x72xf32>
    %28 = tpu.matmul %9, %21, %cst_17 {dimension_numbers = #tpu.dot_dimension_numbers<[1], [0], [0], [1], [0, 0, 1, 1], [], []>} : vector<12x28xf32>, vector<28x72xf32>, vector<12x72xf32> -> vector<12x72xf32>
    %29 = arith.addf %17, %28 : vector<12x72xf32>
    %c1 = arith.constant 1 : index
    %c0_18 = arith.constant 0 : index
    %c0_19 = arith.constant 0 : index
    %30 = vector.load %arg3[%c1, %c0_18, %c0_19] : memref<5x28x72xf32, #tpu.memory_space<vmem>>, vector<1x28x72xf32>
    %31 = vector.shape_cast %30 : vector<1x28x72xf32> to vector<28x72xf32>
    %c1_20 = arith.constant 1 : index
    %c0_21 = arith.constant 0 : index
    %c0_22 = arith.constant 0 : index
    %32 = vector.load %arg4[%c1_20, %c0_21, %c0_22] : memref<5x28x72xf32, #tpu.memory_space<vmem>>, vector<1x28x72xf32>
    %33 = vector.shape_cast %32 : vector<1x28x72xf32> to vector<28x72xf32>
    %cst_23 = arith.constant dense<0.000000e+00> : vector<12x72xf32>
    %34 = tpu.matmul %5, %31, %cst_23 {dimension_numbers = #tpu.dot_dimension_numbers<[1], [0], [0], [1], [0, 0, 1, 1], [], []>} : vector<12x28xf32>, vector<28x72xf32>, vector<12x72xf32> -> vector<12x72xf32>
    %35 = arith.addf %23, %34 : vector<12x72xf32>
    %cst_24 = arith.constant dense<0.000000e+00> : vector<12x72xf32>
    %36 = tpu.matmul %5, %33, %cst_24 {dimension_numbers = #tpu.dot_dimension_numbers<[1], [0], [0], [1], [0, 0, 1, 1], [], []>} : vector<12x28xf32>, vector<28x72xf32>, vector<12x72xf32> -> vector<12x72xf32>
    %37 = arith.addf %25, %36 : vector<12x72xf32>
    %cst_25 = arith.constant dense<0.000000e+00> : vector<12x72xf32>
    %38 = tpu.matmul %10, %31, %cst_25 {dimension_numbers = #tpu.dot_dimension_numbers<[1], [0], [0], [1], [0, 0, 1, 1], [], []>} : vector<12x28xf32>, vector<28x72xf32>, vector<12x72xf32> -> vector<12x72xf32>
    %39 = arith.addf %27, %38 : vector<12x72xf32>
    %cst_26 = arith.constant dense<0.000000e+00> : vector<12x72xf32>
    %40 = tpu.matmul %10, %33, %cst_26 {dimension_numbers = #tpu.dot_dimension_numbers<[1], [0], [0], [1], [0, 0, 1, 1], [], []>} : vector<12x28xf32>, vector<28x72xf32>, vector<12x72xf32> -> vector<12x72xf32>
    %41 = arith.addf %29, %40 : vector<12x72xf32>
    %c2 = arith.constant 2 : index
    %c0_27 = arith.constant 0 : index
    %c0_28 = arith.constant 0 : index
    %42 = vector.load %arg3[%c2, %c0_27, %c0_28] : memref<5x28x72xf32, #tpu.memory_space<vmem>>, vector<1x28x72xf32>
    %43 = vector.shape_cast %42 : vector<1x28x72xf32> to vector<28x72xf32>
    %c2_29 = arith.constant 2 : index
    %c0_30 = arith.constant 0 : index
    %c0_31 = arith.constant 0 : index
    %44 = vector.load %arg4[%c2_29, %c0_30, %c0_31] : memref<5x28x72xf32, #tpu.memory_space<vmem>>, vector<1x28x72xf32>
    %45 = vector.shape_cast %44 : vector<1x28x72xf32> to vector<28x72xf32>
    %cst_32 = arith.constant dense<0.000000e+00> : vector<12x72xf32>
    %46 = tpu.matmul %6, %43, %cst_32 {dimension_numbers = #tpu.dot_dimension_numbers<[1], [0], [0], [1], [0, 0, 1, 1], [], []>} : vector<12x28xf32>, vector<28x72xf32>, vector<12x72xf32> -> vector<12x72xf32>
    %47 = arith.addf %35, %46 : vector<12x72xf32>
    %cst_33 = arith.constant dense<0.000000e+00> : vector<12x72xf32>
    %48 = tpu.matmul %6, %45, %cst_33 {dimension_numbers = #tpu.dot_dimension_numbers<[1], [0], [0], [1], [0, 0, 1, 1], [], []>} : vector<12x28xf32>, vector<28x72xf32>, vector<12x72xf32> -> vector<12x72xf32>
    %49 = arith.addf %37, %48 : vector<12x72xf32>
    %cst_34 = arith.constant dense<0.000000e+00> : vector<12x72xf32>
    %50 = tpu.matmul %11, %43, %cst_34 {dimension_numbers = #tpu.dot_dimension_numbers<[1], [0], [0], [1], [0, 0, 1, 1], [], []>} : vector<12x28xf32>, vector<28x72xf32>, vector<12x72xf32> -> vector<12x72xf32>
    %51 = arith.addf %39, %50 : vector<12x72xf32>
    %cst_35 = arith.constant dense<0.000000e+00> : vector<12x72xf32>
    %52 = tpu.matmul %11, %45, %cst_35 {dimension_numbers = #tpu.dot_dimension_numbers<[1], [0], [0], [1], [0, 0, 1, 1], [], []>} : vector<12x28xf32>, vector<28x72xf32>, vector<12x72xf32> -> vector<12x72xf32>
    %53 = arith.addf %41, %52 : vector<12x72xf32>
    %c3 = arith.constant 3 : index
    %c0_36 = arith.constant 0 : index
    %c0_37 = arith.constant 0 : index
    %54 = vector.load %arg3[%c3, %c0_36, %c0_37] : memref<5x28x72xf32, #tpu.memory_space<vmem>>, vector<1x28x72xf32>
    %55 = vector.shape_cast %54 : vector<1x28x72xf32> to vector<28x72xf32>
    %c3_38 = arith.constant 3 : index
    %c0_39 = arith.constant 0 : index
    %c0_40 = arith.constant 0 : index
    %56 = vector.load %arg4[%c3_38, %c0_39, %c0_40] : memref<5x28x72xf32, #tpu.memory_space<vmem>>, vector<1x28x72xf32>
    %57 = vector.shape_cast %56 : vector<1x28x72xf32> to vector<28x72xf32>
    %cst_41 = arith.constant dense<0.000000e+00> : vector<12x72xf32>
    %58 = tpu.matmul %7, %55, %cst_41 {dimension_numbers = #tpu.dot_dimension_numbers<[1], [0], [0], [1], [0, 0, 1, 1], [], []>} : vector<12x28xf32>, vector<28x72xf32>, vector<12x72xf32> -> vector<12x72xf32>
    %59 = arith.addf %47, %58 : vector<12x72xf32>
    %cst_42 = arith.constant dense<0.000000e+00> : vector<12x72xf32>
    %60 = tpu.matmul %7, %57, %cst_42 {dimension_numbers = #tpu.dot_dimension_numbers<[1], [0], [0], [1], [0, 0, 1, 1], [], []>} : vector<12x28xf32>, vector<28x72xf32>, vector<12x72xf32> -> vector<12x72xf32>
    %61 = arith.addf %49, %60 : vector<12x72xf32>
    %cst_43 = arith.constant dense<0.000000e+00> : vector<12x72xf32>
    %62 = tpu.matmul %12, %55, %cst_43 {dimension_numbers = #tpu.dot_dimension_numbers<[1], [0], [0], [1], [0, 0, 1, 1], [], []>} : vector<12x28xf32>, vector<28x72xf32>, vector<12x72xf32> -> vector<12x72xf32>
    %63 = arith.addf %51, %62 : vector<12x72xf32>
    %cst_44 = arith.constant dense<0.000000e+00> : vector<12x72xf32>
    %64 = tpu.matmul %12, %57, %cst_44 {dimension_numbers = #tpu.dot_dimension_numbers<[1], [0], [0], [1], [0, 0, 1, 1], [], []>} : vector<12x28xf32>, vector<28x72xf32>, vector<12x72xf32> -> vector<12x72xf32>
    %65 = arith.addf %53, %64 : vector<12x72xf32>
    %c4 = arith.constant 4 : index
    %c0_45 = arith.constant 0 : index
    %c0_46 = arith.constant 0 : index
    %66 = vector.load %arg3[%c4, %c0_45, %c0_46] : memref<5x28x72xf32, #tpu.memory_space<vmem>>, vector<1x28x72xf32>
    %67 = vector.shape_cast %66 : vector<1x28x72xf32> to vector<28x72xf32>
    %c4_47 = arith.constant 4 : index
    %c0_48 = arith.constant 0 : index
    %c0_49 = arith.constant 0 : index
    %68 = vector.load %arg4[%c4_47, %c0_48, %c0_49] : memref<5x28x72xf32, #tpu.memory_space<vmem>>, vector<1x28x72xf32>
    %69 = vector.shape_cast %68 : vector<1x28x72xf32> to vector<28x72xf32>
    %cst_50 = arith.constant dense<0.000000e+00> : vector<12x72xf32>
    %70 = tpu.matmul %8, %67, %cst_50 {dimension_numbers = #tpu.dot_dimension_numbers<[1], [0], [0], [1], [0, 0, 1, 1], [], []>} : vector<12x28xf32>, vector<28x72xf32>, vector<12x72xf32> -> vector<12x72xf32>
    %71 = arith.addf %59, %70 : vector<12x72xf32>
    %cst_51 = arith.constant dense<0.000000e+00> : vector<12x72xf32>
    %72 = tpu.matmul %8, %69, %cst_51 {dimension_numbers = #tpu.dot_dimension_numbers<[1], [0], [0], [1], [0, 0, 1, 1], [], []>} : vector<12x28xf32>, vector<28x72xf32>, vector<12x72xf32> -> vector<12x72xf32>
    %73 = arith.addf %61, %72 : vector<12x72xf32>
    %cst_52 = arith.constant dense<0.000000e+00> : vector<12x72xf32>
    %74 = tpu.matmul %13, %67, %cst_52 {dimension_numbers = #tpu.dot_dimension_numbers<[1], [0], [0], [1], [0, 0, 1, 1], [], []>} : vector<12x28xf32>, vector<28x72xf32>, vector<12x72xf32> -> vector<12x72xf32>
    %75 = arith.addf %63, %74 : vector<12x72xf32>
    %cst_53 = arith.constant dense<0.000000e+00> : vector<12x72xf32>
    %76 = tpu.matmul %13, %69, %cst_53 {dimension_numbers = #tpu.dot_dimension_numbers<[1], [0], [0], [1], [0, 0, 1, 1], [], []>} : vector<12x28xf32>, vector<28x72xf32>, vector<12x72xf32> -> vector<12x72xf32>
    %77 = arith.addf %65, %76 : vector<12x72xf32>
    %78 = arith.maximumf %71, %73 : vector<12x72xf32>
    %79 = arith.maximumf %75, %77 : vector<12x72xf32>
    %80 = arith.maximumf %78, %79 : vector<12x72xf32>
    %c0_54 = arith.constant 0 : index
    %c0_55 = arith.constant 0 : index
    %81 = vector.load %arg5[%c0_54, %c0_55] : memref<1x72xf32, #tpu.memory_space<vmem>>, vector<1x72xf32>
    %82 = vector.broadcast %81 : vector<1x72xf32> to vector<12x72xf32>
    %83 = arith.addf %80, %82 : vector<12x72xf32>
    %cst_56 = arith.constant 0.000000e+00 : f32
    %84 = vector.broadcast %cst_56 : f32 to vector<12x72xf32>
    %85 = arith.maximumf %83, %84 : vector<12x72xf32>
    %cst_57 = arith.constant 0.000000e+00 : f32
    %86 = vector.broadcast %cst_57 : f32 to vector<8x64xf32>
    %cst_58 = arith.constant 0.000000e+00 : f32
    %87 = vector.broadcast %cst_58 : f32 to vector<8x64xf32>
    %88 = vector.extract_strided_slice %85 {offsets = [0, 0], sizes = [8, 72], strides = [1, 1]} : vector<12x72xf32> to vector<8x72xf32>
    %c0_59 = arith.constant 0 : index
    %c0_60 = arith.constant 0 : index
    %c0_61 = arith.constant 0 : index
    %89 = vector.load %arg6[%c0_59, %c0_60, %c0_61] : memref<5x72x64xf32, #tpu.memory_space<vmem>>, vector<1x72x64xf32>
    %90 = vector.shape_cast %89 : vector<1x72x64xf32> to vector<72x64xf32>
    %cst_62 = arith.constant dense<0.000000e+00> : vector<8x64xf32>
    %91 = tpu.matmul %88, %90, %cst_62 {dimension_numbers = #tpu.dot_dimension_numbers<[1], [0], [0], [1], [0, 0, 1, 1], [], []>} : vector<8x72xf32>, vector<72x64xf32>, vector<8x64xf32> -> vector<8x64xf32>
    %92 = arith.addf %86, %91 : vector<8x64xf32>
    %c0_63 = arith.constant 0 : index
    %c0_64 = arith.constant 0 : index
    %c0_65 = arith.constant 0 : index
    %93 = vector.load %arg7[%c0_63, %c0_64, %c0_65] : memref<5x72x64xf32, #tpu.memory_space<vmem>>, vector<1x72x64xf32>
    %94 = vector.shape_cast %93 : vector<1x72x64xf32> to vector<72x64xf32>
    %cst_66 = arith.constant dense<0.000000e+00> : vector<8x64xf32>
    %95 = tpu.matmul %88, %94, %cst_66 {dimension_numbers = #tpu.dot_dimension_numbers<[1], [0], [0], [1], [0, 0, 1, 1], [], []>} : vector<8x72xf32>, vector<72x64xf32>, vector<8x64xf32> -> vector<8x64xf32>
    %96 = arith.addf %87, %95 : vector<8x64xf32>
    %97 = vector.extract_strided_slice %85 {offsets = [1, 0], sizes = [8, 72], strides = [1, 1]} : vector<12x72xf32> to vector<8x72xf32>
    %c1_67 = arith.constant 1 : index
    %c0_68 = arith.constant 0 : index
    %c0_69 = arith.constant 0 : index
    %98 = vector.load %arg6[%c1_67, %c0_68, %c0_69] : memref<5x72x64xf32, #tpu.memory_space<vmem>>, vector<1x72x64xf32>
    %99 = vector.shape_cast %98 : vector<1x72x64xf32> to vector<72x64xf32>
    %cst_70 = arith.constant dense<0.000000e+00> : vector<8x64xf32>
    %100 = tpu.matmul %97, %99, %cst_70 {dimension_numbers = #tpu.dot_dimension_numbers<[1], [0], [0], [1], [0, 0, 1, 1], [], []>} : vector<8x72xf32>, vector<72x64xf32>, vector<8x64xf32> -> vector<8x64xf32>
    %101 = arith.addf %92, %100 : vector<8x64xf32>
    %c1_71 = arith.constant 1 : index
    %c0_72 = arith.constant 0 : index
    %c0_73 = arith.constant 0 : index
    %102 = vector.load %arg7[%c1_71, %c0_72, %c0_73] : memref<5x72x64xf32, #tpu.memory_space<vmem>>, vector<1x72x64xf32>
    %103 = vector.shape_cast %102 : vector<1x72x64xf32> to vector<72x64xf32>
    %cst_74 = arith.constant dense<0.000000e+00> : vector<8x64xf32>
    %104 = tpu.matmul %97, %103, %cst_74 {dimension_numbers = #tpu.dot_dimension_numbers<[1], [0], [0], [1], [0, 0, 1, 1], [], []>} : vector<8x72xf32>, vector<72x64xf32>, vector<8x64xf32> -> vector<8x64xf32>
    %105 = arith.addf %96, %104 : vector<8x64xf32>
    %106 = vector.extract_strided_slice %85 {offsets = [2, 0], sizes = [8, 72], strides = [1, 1]} : vector<12x72xf32> to vector<8x72xf32>
    %c2_75 = arith.constant 2 : index
    %c0_76 = arith.constant 0 : index
    %c0_77 = arith.constant 0 : index
    %107 = vector.load %arg6[%c2_75, %c0_76, %c0_77] : memref<5x72x64xf32, #tpu.memory_space<vmem>>, vector<1x72x64xf32>
    %108 = vector.shape_cast %107 : vector<1x72x64xf32> to vector<72x64xf32>
    %cst_78 = arith.constant dense<0.000000e+00> : vector<8x64xf32>
    %109 = tpu.matmul %106, %108, %cst_78 {dimension_numbers = #tpu.dot_dimension_numbers<[1], [0], [0], [1], [0, 0, 1, 1], [], []>} : vector<8x72xf32>, vector<72x64xf32>, vector<8x64xf32> -> vector<8x64xf32>
    %110 = arith.addf %101, %109 : vector<8x64xf32>
    %c2_79 = arith.constant 2 : index
    %c0_80 = arith.constant 0 : index
    %c0_81 = arith.constant 0 : index
    %111 = vector.load %arg7[%c2_79, %c0_80, %c0_81] : memref<5x72x64xf32, #tpu.memory_space<vmem>>, vector<1x72x64xf32>
    %112 = vector.shape_cast %111 : vector<1x72x64xf32> to vector<72x64xf32>
    %cst_82 = arith.constant dense<0.000000e+00> : vector<8x64xf32>
    %113 = tpu.matmul %106, %112, %cst_82 {dimension_numbers = #tpu.dot_dimension_numbers<[1], [0], [0], [1], [0, 0, 1, 1], [], []>} : vector<8x72xf32>, vector<72x64xf32>, vector<8x64xf32> -> vector<8x64xf32>
    %114 = arith.addf %105, %113 : vector<8x64xf32>
    %115 = vector.extract_strided_slice %85 {offsets = [3, 0], sizes = [8, 72], strides = [1, 1]} : vector<12x72xf32> to vector<8x72xf32>
    %c3_83 = arith.constant 3 : index
    %c0_84 = arith.constant 0 : index
    %c0_85 = arith.constant 0 : index
    %116 = vector.load %arg6[%c3_83, %c0_84, %c0_85] : memref<5x72x64xf32, #tpu.memory_space<vmem>>, vector<1x72x64xf32>
    %117 = vector.shape_cast %116 : vector<1x72x64xf32> to vector<72x64xf32>
    %cst_86 = arith.constant dense<0.000000e+00> : vector<8x64xf32>
    %118 = tpu.matmul %115, %117, %cst_86 {dimension_numbers = #tpu.dot_dimension_numbers<[1], [0], [0], [1], [0, 0, 1, 1], [], []>} : vector<8x72xf32>, vector<72x64xf32>, vector<8x64xf32> -> vector<8x64xf32>
    %119 = arith.addf %110, %118 : vector<8x64xf32>
    %c3_87 = arith.constant 3 : index
    %c0_88 = arith.constant 0 : index
    %c0_89 = arith.constant 0 : index
    %120 = vector.load %arg7[%c3_87, %c0_88, %c0_89] : memref<5x72x64xf32, #tpu.memory_space<vmem>>, vector<1x72x64xf32>
    %121 = vector.shape_cast %120 : vector<1x72x64xf32> to vector<72x64xf32>
    %cst_90 = arith.constant dense<0.000000e+00> : vector<8x64xf32>
    %122 = tpu.matmul %115, %121, %cst_90 {dimension_numbers = #tpu.dot_dimension_numbers<[1], [0], [0], [1], [0, 0, 1, 1], [], []>} : vector<8x72xf32>, vector<72x64xf32>, vector<8x64xf32> -> vector<8x64xf32>
    %123 = arith.addf %114, %122 : vector<8x64xf32>
    %124 = vector.extract_strided_slice %85 {offsets = [4, 0], sizes = [8, 72], strides = [1, 1]} : vector<12x72xf32> to vector<8x72xf32>
    %c4_91 = arith.constant 4 : index
    %c0_92 = arith.constant 0 : index
    %c0_93 = arith.constant 0 : index
    %125 = vector.load %arg6[%c4_91, %c0_92, %c0_93] : memref<5x72x64xf32, #tpu.memory_space<vmem>>, vector<1x72x64xf32>
    %126 = vector.shape_cast %125 : vector<1x72x64xf32> to vector<72x64xf32>
    %cst_94 = arith.constant dense<0.000000e+00> : vector<8x64xf32>
    %127 = tpu.matmul %124, %126, %cst_94 {dimension_numbers = #tpu.dot_dimension_numbers<[1], [0], [0], [1], [0, 0, 1, 1], [], []>} : vector<8x72xf32>, vector<72x64xf32>, vector<8x64xf32> -> vector<8x64xf32>
    %128 = arith.addf %119, %127 : vector<8x64xf32>
    %c4_95 = arith.constant 4 : index
    %c0_96 = arith.constant 0 : index
    %c0_97 = arith.constant 0 : index
    %129 = vector.load %arg7[%c4_95, %c0_96, %c0_97] : memref<5x72x64xf32, #tpu.memory_space<vmem>>, vector<1x72x64xf32>
    %130 = vector.shape_cast %129 : vector<1x72x64xf32> to vector<72x64xf32>
    %cst_98 = arith.constant dense<0.000000e+00> : vector<8x64xf32>
    %131 = tpu.matmul %124, %130, %cst_98 {dimension_numbers = #tpu.dot_dimension_numbers<[1], [0], [0], [1], [0, 0, 1, 1], [], []>} : vector<8x72xf32>, vector<72x64xf32>, vector<8x64xf32> -> vector<8x64xf32>
    %132 = arith.addf %123, %131 : vector<8x64xf32>
    %133 = arith.maximumf %128, %132 : vector<8x64xf32>
    %cst_99 = arith.constant 0.000000e+00 : f32
    %134 = vector.broadcast %cst_99 : f32 to vector<1x120xf32>
    %135 = vector.extract_strided_slice %133 {offsets = [0, 0], sizes = [1, 64], strides = [1, 1]} : vector<8x64xf32> to vector<1x64xf32>
    %136 = vector.extract_strided_slice %133 {offsets = [1, 0], sizes = [1, 64], strides = [1, 1]} : vector<8x64xf32> to vector<1x64xf32>
    %137 = arith.maximumf %135, %136 : vector<1x64xf32>
    %c0_100 = arith.constant 0 : index
    %c0_101 = arith.constant 0 : index
    %138 = vector.load %arg8[%c0_100, %c0_101] : memref<1x64xf32, #tpu.memory_space<vmem>>, vector<1x64xf32>
    %139 = arith.addf %137, %138 : vector<1x64xf32>
    %cst_102 = arith.constant 0.000000e+00 : f32
    %140 = vector.broadcast %cst_102 : f32 to vector<1x64xf32>
    %141 = arith.maximumf %139, %140 : vector<1x64xf32>
    %c0_103 = arith.constant 0 : index
    %c0_104 = arith.constant 0 : index
    %c0_105 = arith.constant 0 : index
    %142 = vector.load %arg9[%c0_103, %c0_104, %c0_105] : memref<4x64x120xf32, #tpu.memory_space<vmem>>, vector<1x64x120xf32>
    %143 = vector.shape_cast %142 : vector<1x64x120xf32> to vector<64x120xf32>
    %cst_106 = arith.constant dense<0.000000e+00> : vector<1x120xf32>
    %144 = tpu.matmul %141, %143, %cst_106 {dimension_numbers = #tpu.dot_dimension_numbers<[1], [0], [0], [1], [0, 0, 1, 1], [], []>} : vector<1x64xf32>, vector<64x120xf32>, vector<1x120xf32> -> vector<1x120xf32>
    %145 = arith.addf %134, %144 : vector<1x120xf32>
    %146 = vector.extract_strided_slice %133 {offsets = [2, 0], sizes = [1, 64], strides = [1, 1]} : vector<8x64xf32> to vector<1x64xf32>
    %147 = vector.extract_strided_slice %133 {offsets = [3, 0], sizes = [1, 64], strides = [1, 1]} : vector<8x64xf32> to vector<1x64xf32>
    %148 = arith.maximumf %146, %147 : vector<1x64xf32>
    %c0_107 = arith.constant 0 : index
    %c0_108 = arith.constant 0 : index
    %149 = vector.load %arg8[%c0_107, %c0_108] : memref<1x64xf32, #tpu.memory_space<vmem>>, vector<1x64xf32>
    %150 = arith.addf %148, %149 : vector<1x64xf32>
    %cst_109 = arith.constant 0.000000e+00 : f32
    %151 = vector.broadcast %cst_109 : f32 to vector<1x64xf32>
    %152 = arith.maximumf %150, %151 : vector<1x64xf32>
    %c1_110 = arith.constant 1 : index
    %c0_111 = arith.constant 0 : index
    %c0_112 = arith.constant 0 : index
    %153 = vector.load %arg9[%c1_110, %c0_111, %c0_112] : memref<4x64x120xf32, #tpu.memory_space<vmem>>, vector<1x64x120xf32>
    %154 = vector.shape_cast %153 : vector<1x64x120xf32> to vector<64x120xf32>
    %cst_113 = arith.constant dense<0.000000e+00> : vector<1x120xf32>
    %155 = tpu.matmul %152, %154, %cst_113 {dimension_numbers = #tpu.dot_dimension_numbers<[1], [0], [0], [1], [0, 0, 1, 1], [], []>} : vector<1x64xf32>, vector<64x120xf32>, vector<1x120xf32> -> vector<1x120xf32>
    %156 = arith.addf %145, %155 : vector<1x120xf32>
    %157 = vector.extract_strided_slice %133 {offsets = [4, 0], sizes = [1, 64], strides = [1, 1]} : vector<8x64xf32> to vector<1x64xf32>
    %158 = vector.extract_strided_slice %133 {offsets = [5, 0], sizes = [1, 64], strides = [1, 1]} : vector<8x64xf32> to vector<1x64xf32>
    %159 = arith.maximumf %157, %158 : vector<1x64xf32>
    %c0_114 = arith.constant 0 : index
    %c0_115 = arith.constant 0 : index
    %160 = vector.load %arg8[%c0_114, %c0_115] : memref<1x64xf32, #tpu.memory_space<vmem>>, vector<1x64xf32>
    %161 = arith.addf %159, %160 : vector<1x64xf32>
    %cst_116 = arith.constant 0.000000e+00 : f32
    %162 = vector.broadcast %cst_116 : f32 to vector<1x64xf32>
    %163 = arith.maximumf %161, %162 : vector<1x64xf32>
    %c2_117 = arith.constant 2 : index
    %c0_118 = arith.constant 0 : index
    %c0_119 = arith.constant 0 : index
    %164 = vector.load %arg9[%c2_117, %c0_118, %c0_119] : memref<4x64x120xf32, #tpu.memory_space<vmem>>, vector<1x64x120xf32>
    %165 = vector.shape_cast %164 : vector<1x64x120xf32> to vector<64x120xf32>
    %cst_120 = arith.constant dense<0.000000e+00> : vector<1x120xf32>
    %166 = tpu.matmul %163, %165, %cst_120 {dimension_numbers = #tpu.dot_dimension_numbers<[1], [0], [0], [1], [0, 0, 1, 1], [], []>} : vector<1x64xf32>, vector<64x120xf32>, vector<1x120xf32> -> vector<1x120xf32>
    %167 = arith.addf %156, %166 : vector<1x120xf32>
    %168 = vector.extract_strided_slice %133 {offsets = [6, 0], sizes = [1, 64], strides = [1, 1]} : vector<8x64xf32> to vector<1x64xf32>
    %169 = vector.extract_strided_slice %133 {offsets = [7, 0], sizes = [1, 64], strides = [1, 1]} : vector<8x64xf32> to vector<1x64xf32>
    %170 = arith.maximumf %168, %169 : vector<1x64xf32>
    %c0_121 = arith.constant 0 : index
    %c0_122 = arith.constant 0 : index
    %171 = vector.load %arg8[%c0_121, %c0_122] : memref<1x64xf32, #tpu.memory_space<vmem>>, vector<1x64xf32>
    %172 = arith.addf %170, %171 : vector<1x64xf32>
    %cst_123 = arith.constant 0.000000e+00 : f32
    %173 = vector.broadcast %cst_123 : f32 to vector<1x64xf32>
    %174 = arith.maximumf %172, %173 : vector<1x64xf32>
    %c3_124 = arith.constant 3 : index
    %c0_125 = arith.constant 0 : index
    %c0_126 = arith.constant 0 : index
    %175 = vector.load %arg9[%c3_124, %c0_125, %c0_126] : memref<4x64x120xf32, #tpu.memory_space<vmem>>, vector<1x64x120xf32>
    %176 = vector.shape_cast %175 : vector<1x64x120xf32> to vector<64x120xf32>
    %cst_127 = arith.constant dense<0.000000e+00> : vector<1x120xf32>
    %177 = tpu.matmul %174, %176, %cst_127 {dimension_numbers = #tpu.dot_dimension_numbers<[1], [0], [0], [1], [0, 0, 1, 1], [], []>} : vector<1x64xf32>, vector<64x120xf32>, vector<1x120xf32> -> vector<1x120xf32>
    %178 = arith.addf %167, %177 : vector<1x120xf32>
    %c0_128 = arith.constant 0 : index
    %c0_129 = arith.constant 0 : index
    %179 = vector.load %arg10[%c0_128, %c0_129] : memref<1x120xf32, #tpu.memory_space<vmem>>, vector<1x120xf32>
    %180 = arith.addf %178, %179 : vector<1x120xf32>
    %cst_130 = arith.constant 0.000000e+00 : f32
    %181 = vector.broadcast %cst_130 : f32 to vector<1x120xf32>
    %182 = arith.maximumf %180, %181 : vector<1x120xf32>
    %c0_131 = arith.constant 0 : index
    %c0_132 = arith.constant 0 : index
    %183 = vector.load %arg11[%c0_131, %c0_132] : memref<120x84xf32, #tpu.memory_space<vmem>>, vector<120x84xf32>
    %cst_133 = arith.constant dense<0.000000e+00> : vector<1x84xf32>
    %184 = tpu.matmul %182, %183, %cst_133 {dimension_numbers = #tpu.dot_dimension_numbers<[1], [0], [0], [1], [0, 0, 1, 1], [], []>} : vector<1x120xf32>, vector<120x84xf32>, vector<1x84xf32> -> vector<1x84xf32>
    %c0_134 = arith.constant 0 : index
    %c0_135 = arith.constant 0 : index
    %185 = vector.load %arg12[%c0_134, %c0_135] : memref<1x84xf32, #tpu.memory_space<vmem>>, vector<1x84xf32>
    %186 = arith.addf %184, %185 : vector<1x84xf32>
    %cst_136 = arith.constant 0.000000e+00 : f32
    %187 = vector.broadcast %cst_136 : f32 to vector<1x84xf32>
    %188 = arith.maximumf %186, %187 : vector<1x84xf32>
    %c0_137 = arith.constant 0 : index
    %c0_138 = arith.constant 0 : index
    %189 = vector.load %arg13[%c0_137, %c0_138] : memref<84x10xf32, #tpu.memory_space<vmem>>, vector<84x10xf32>
    %cst_139 = arith.constant dense<0.000000e+00> : vector<1x10xf32>
    %190 = tpu.matmul %188, %189, %cst_139 {dimension_numbers = #tpu.dot_dimension_numbers<[1], [0], [0], [1], [0, 0, 1, 1], [], []>} : vector<1x84xf32>, vector<84x10xf32>, vector<1x10xf32> -> vector<1x10xf32>
    %c0_140 = arith.constant 0 : index
    %c0_141 = arith.constant 0 : index
    %191 = vector.load %arg14[%c0_140, %c0_141] : memref<1x10xf32, #tpu.memory_space<vmem>>, vector<1x10xf32>
    %192 = arith.addf %190, %191 : vector<1x10xf32>
    %c0_142 = arith.constant 0 : index
    %c0_143 = arith.constant 0 : index
    %c0_144 = arith.constant 0 : index
    %193 = vector.load %arg15[%c0_142, %c0_143, %c0_144] : memref<1x1x10xf32, #tpu.memory_space<vmem>>, vector<1x1x10xf32>
    %194 = vector.shape_cast %193 : vector<1x1x10xf32> to vector<1x10xf32>
    %195 = vector.shape_cast %192 : vector<1x10xf32> to vector<1x1x10xf32>
    tpu.vector_store %arg15[%c0_142, %c0_143, %c0_144], %195 {strides = array<i32>} : memref<1x1x10xf32, #tpu.memory_space<vmem>>, vector<1x1x10xf32>,
    return
  }
  func.func @transform_0(%arg0: i32) -> (i32, i32, i32) {
    %c0_i32 = arith.constant 0 : i32
    %c0_i32_0 = arith.constant 0 : i32
    %c0_i32_1 = arith.constant 0 : i32
    return %arg0, %c0_i32, %c0_i32_0 : i32, i32, i32
  }
  func.func @transform_1(%arg0: i32) -> (i32, i32, i32) {
    %c0_i32 = arith.constant 0 : i32
    %c0_i32_0 = arith.constant 0 : i32
    %c0_i32_1 = arith.constant 0 : i32
    return %arg0, %c0_i32, %c0_i32_0 : i32, i32, i32
  }
  func.func @transform_2(%arg0: i32) -> (i32, i32, i32) {
    %c0_i32 = arith.constant 0 : i32
    %c0_i32_0 = arith.constant 0 : i32
    %c0_i32_1 = arith.constant 0 : i32
    %c0_i32_2 = arith.constant 0 : i32
    return %c0_i32, %c0_i32_0, %c0_i32_1 : i32, i32, i32
  }
  func.func @transform_3(%arg0: i32) -> (i32, i32, i32) {
    %c0_i32 = arith.constant 0 : i32
    %c0_i32_0 = arith.constant 0 : i32
    %c0_i32_1 = arith.constant 0 : i32
    %c0_i32_2 = arith.constant 0 : i32
    return %c0_i32, %c0_i32_0, %c0_i32_1 : i32, i32, i32
  }
  func.func @transform_4(%arg0: i32) -> (i32, i32) {
    %c0_i32 = arith.constant 0 : i32
    %c0_i32_0 = arith.constant 0 : i32
    %c0_i32_1 = arith.constant 0 : i32
    return %c0_i32, %c0_i32_0 : i32, i32
  }
  func.func @transform_5(%arg0: i32) -> (i32, i32, i32) {
    %c0_i32 = arith.constant 0 : i32
    %c0_i32_0 = arith.constant 0 : i32
    %c0_i32_1 = arith.constant 0 : i32
    %c0_i32_2 = arith.constant 0 : i32
    return %c0_i32, %c0_i32_0, %c0_i32_1 : i32, i32, i32
  }
  func.func @transform_6(%arg0: i32) -> (i32, i32, i32) {
    %c0_i32 = arith.constant 0 : i32
    %c0_i32_0 = arith.constant 0 : i32
    %c0_i32_1 = arith.constant 0 : i32
    %c0_i32_2 = arith.constant 0 : i32
    return %c0_i32, %c0_i32_0, %c0_i32_1 : i32, i32, i32
  }
  func.func @transform_7(%arg0: i32) -> (i32, i32) {
    %c0_i32 = arith.constant 0 : i32
    %c0_i32_0 = arith.constant 0 : i32
    %c0_i32_1 = arith.constant 0 : i32
    return %c0_i32, %c0_i32_0 : i32, i32
  }
  func.func @transform_8(%arg0: i32) -> (i32, i32, i32) {
    %c0_i32 = arith.constant 0 : i32
    %c0_i32_0 = arith.constant 0 : i32
    %c0_i32_1 = arith.constant 0 : i32
    %c0_i32_2 = arith.constant 0 : i32
    return %c0_i32, %c0_i32_0, %c0_i32_1 : i32, i32, i32
  }
  func.func @transform_9(%arg0: i32) -> (i32, i32) {
    %c0_i32 = arith.constant 0 : i32
    %c0_i32_0 = arith.constant 0 : i32
    %c0_i32_1 = arith.constant 0 : i32
    return %c0_i32, %c0_i32_0 : i32, i32
  }
  func.func @transform_10(%arg0: i32) -> (i32, i32) {
    %c0_i32 = arith.constant 0 : i32
    %c0_i32_0 = arith.constant 0 : i32
    %c0_i32_1 = arith.constant 0 : i32
    return %c0_i32, %c0_i32_0 : i32, i32
  }
  func.func @transform_11(%arg0: i32) -> (i32, i32) {
    %c0_i32 = arith.constant 0 : i32
    %c0_i32_0 = arith.constant 0 : i32
    %c0_i32_1 = arith.constant 0 : i32
    return %c0_i32, %c0_i32_0 : i32, i32
  }
  func.func @transform_12(%arg0: i32) -> (i32, i32) {
    %c0_i32 = arith.constant 0 : i32
    %c0_i32_0 = arith.constant 0 : i32
    %c0_i32_1 = arith.constant 0 : i32
    return %c0_i32, %c0_i32_0 : i32, i32
  }
  func.func @transform_13(%arg0: i32) -> (i32, i32) {
    %c0_i32 = arith.constant 0 : i32
    %c0_i32_0 = arith.constant 0 : i32
    %c0_i32_1 = arith.constant 0 : i32
    return %c0_i32, %c0_i32_0 : i32, i32
  }
  func.func @transform_14(%arg0: i32) -> (i32, i32, i32) {
    %c0_i32 = arith.constant 0 : i32
    %c0_i32_0 = arith.constant 0 : i32
    %c0_i32_1 = arith.constant 0 : i32
    return %arg0, %c0_i32, %c0_i32_0 : i32, i32, i32
  }
}

</mosaic_0001>

<bundles_post_ra>
// kernel: simple_cnn_forward.1
= control target key start
LH: loop header
LB: loop body
LE: loop exit
PB: predicated region body
PF: predicated region fallthrough
CT: control target
= control target key end

     0   :  { %19 = vsyncpa [#allocation3], 0  ;;  %s6317_s0 = inlined_call_operand.vmem [shape: f32[2,14,28], index: 0, kind: input, shape index: {}]   ;;  %s6318_s1 = inlined_call_operand.vmem [shape: f32[2,14,28], index: 1, kind: input, shape index: {}]   ;;  %s6319_s2 = inlined_call_operand.vmem [shape: f32[5,28,72], index: 2, kind: input, shape index: {}]   ;;  %s6320_s3 = inlined_call_operand.vmem [shape: f32[5,28,72], index: 3, kind: input, shape index: {}]   ;;  %s6321_s4 = inlined_call_operand.vmem [shape: f32[1,72], index: 4, kind: input, shape index: {}]   ;;  %s6322_s5 = inlined_call_operand.vmem [shape: f32[5,72,64], index: 5, kind: input, shape index: {}]   ;;  %s6323_s6 = inlined_call_operand.vmem [shape: f32[5,72,64], index: 6, kind: input, shape index: {}]   ;;  %s6324_s7 = inlined_call_operand.vmem [shape: f32[1,64], index: 7, kind: input, shape index: {}]   ;;  %s6325_s8 = inlined_call_operand.vmem [shape: f32[4,64,120], index: 8, kind: input, shape index: {}]   ;;  %s6326_s9 = inlined_call_operand.vmem [shape: f32[1,120], index: 9, kind: input, shape index: {}]   ;;  %s6327_s10 = inlined_call_operand.vmem [shape: f32[120,84], index: 10, kind: input, shape index: {}]   ;;  %s6328_s11 = inlined_call_operand.vmem [shape: f32[1,84], index: 11, kind: input, shape index: {}]   ;;  %s6329_s12 = inlined_call_operand.vmem [shape: f32[84,10], index: 12, kind: input, shape index: {}]   ;;  %s6330_s13 = inlined_call_operand.vmem [shape: f32[1,10], index: 13, kind: input, shape index: {}]   ;;  %s6331_s14 = inlined_call_operand.hbm [shape: f32[2,1,10], index: 14, kind: output, shape index: {}]  }
   0x1   :  { %21 = vsyncpa [#allocation3 + $0x1], 0  ;;  %s5300_s29 = smov 0   ;;  %s5302_s30 = smov 0  }
   0x2   :  { %s5304_s15 = smov 0   ;;  %s5306_s16 = smov 0  }
   0x3 LB: > { %6336 = sst [smem:[#allocation5_spill]] %s5214_s15  ;;  %s5321_s17 = sadd.s32 4294967295, %s5218_s16   ;;  %s5218_s16 = sphi %s5306_s16, %s6345_s16   ;;  %s5214_s15 = sphi %s5304_s15, %s6347_s15   ;;  %s5210_s30 = sphi %s5302_s30, %s6349_s30   ;;  %s5206_s29 = sphi %s5300_s29, %s6348_s29  }
   0x4   : > { %s3594_s18 = sadd.s32 4294967294, %s5218_s16   ;;  %s5325_s19 = sadd.s32 1, %s5218_s16  }
   0x5   : > { %6337 = sst [smem:[#allocation6_spill]] %s5325_s19  ;;  %s338_s20 = sadd.s32 1, %s5214_s15 }
   0x6   : > { %s335_s21 = ssub.s32 %s5218_s16, %s5325_s19  ;;  %p348_p0 = scmp.ne.s32.totalorder %s5214_s15, %s5210_s30 }
   0x7   : > { %p336_p1 = scmp.eq.s32.totalorder %s335_s21, 0  ;;  %p349_p2 = scmp.eq.s32.totalorder %s5321_s17, 1 }
   0x8   : > { %p354_p3 = scmp.ne.s32.totalorder %s5210_s30, %s5206_s29  ;;  %p355_p4 = scmp.eq.s32.totalorder %s3594_s18, 1 }
   0x9   : > { %s5336_s22 = scalar_select %p336_p1, %s5214_s15, %s338_s20  }
   0xa   : > { %p5338_p5 = por %p349_p2, %p348_p0  ;;  %p5342_p6 = por %p355_p4, %p354_p3 }
   0xb   : > { %6338 = sst [smem:[#allocation7_spill]] %s5336_s22  ;;  %p3597_p7 = scmp.ge.s32.totalorder %s5218_s16, 1 }
   0xc   : > { %s6340_s24 = scalar_select %p5342_p6, 1, 0 }
   0xd   : > { %p425_p8 = scmp.lt.s32.totalorder %s5218_s16, 3 }
   0xe   : > { %6341 = sst [smem:[#allocation8_spill]] %s6340_s24 }
   0xf   : > { %p426_p9 = pnand %p3597_p7, %p425_p8 }
  0x10   : > { %v3602_v0 = vld [vmem:[%s6319_s2 + $0x20] sm:$0xff] (!%p426_p9)  ;;  %v3603_v1 = vld [vmem:[%s6319_s2 + $0x28] sm:$0xff] (!%p426_p9)  ;;  %vm514_vm0 = vcmask (!%p426_p9), 1043456   ;;  %p475_p10 = scmp.lt.s32.totalorder (!%p426_p9), %s5321_s17, 1  ;;  %v3604_v5 = vld [vmem:[%s6319_s2 + $0x30] sm:$0xff] (!%p426_p9)  ;;  %vm5220_vm1 = vmmov (!%p426_p9), 1  }
  0x11   : > { %429 = sbr.rel (%p426_p9) target bundleno = 1305 (0x519), region = 76  ;;  %v3606_v2 = vld [vmem:[%s6320_s3 + $0x20] sm:$0xff] (!%p426_p9)  ;;  %v5358_v3 = vpack.c.bf16 (!%p426_p9), %v3603_v1, %v3602_v0  ;;  %v3607_v4 = vld [vmem:[%s6320_s3 + $0x28] sm:$0xff] (!%p426_p9)  ;;  %v3605_v6 = vld [vmem:[%s6319_s2 + $0x38] sm:$0xf] (!%p426_p9)  ;;  %vm507_vm3 = vcmask (!%p426_p9), 228352  }
  0x12   : > { %v4681_v7 = vpack.c.bf16 (!%p426_p9), %v3607_v4, %v3606_v2  ;;  %v5369_v8 = vpack.c.bf16 (!%p426_p9), %v3605_v6, %v3604_v5  ;;  %vm5372_vm2 = vmpackc.low (!%p426_p9), %vm514_vm0, %vm5220_vm1  ;;  %v3608_v10 = vld [vmem:[%s6320_s3 + $0x30] sm:$0xff] (!%p426_p9)  ;;  %v3609_v11 = vld [vmem:[%s6320_s3 + $0x38] sm:$0xf] (!%p426_p9)  ;;  %vm1642_vm4 = vcmask (!%p426_p9), 1045504   ;;  %vm833_vm5 = vcmask (!%p426_p9), 1046528   ;;  %s3808_s25 = sshll.u32 (!%p426_p9), %s5321_s17, 4 }
  0x13   : > { %4662 = vmatprep.subr.bf16.mxu0 (!%p426_p9), %v5358_v3  ;;  %v4685_v12 = vpack.c.bf16 (!%p426_p9), %v3609_v11, %v3608_v10  ;;  %v489_v13 = vld [vmem:[%s6319_s2] sm:$0xff] (!%p426_p9)  ;;  %v490_v14 = vld [vmem:[%s6319_s2 + $0x8] sm:$0xff] (!%p426_p9)  ;;  %v491_v20 = vld [vmem:[%s6319_s2 + $0x10] sm:$0xff] (!%p426_p9)  ;;  %vm5223_vm6 = vmmov (!%p426_p9), 0   ;;  %vm2185_vm7 = vcmask (!%p426_p9), 588800   ;;  %vm2657_vm8 = vcmask (!%p426_p9), 1044480   ;;  %s6275_s15 = scalar_lea.hbm (!%p426_p9), %s6331_s14, %s3808_s25 }
  0x14   : > { %v493_v15 = vld [vmem:[%s6320_s3] sm:$0xff] (!%p426_p9)  ;;  %4682 = vmatprep.subr.bf16.mxu1 (!%p426_p9), %v4681_v7  ;;  %4664 = vmatpush3.bf16.msra.mxu0 (!%p426_p9), %v5358_v3  ;;  %v494_v16 = vld [vmem:[%s6320_s3 + $0x8] sm:$0xff] (!%p426_p9)  ;;  %v4671_v17 = vpack.c.bf16 (!%p426_p9), %v490_v14, %v489_v13  ;;  %v492_v21 = vld [vmem:[%s6319_s2 + $0x18] sm:$0xf] (!%p426_p9)  ;;  %vm3017_vm9 = vcmask (!%p426_p9), 523264   ;;  %vm3348_vm10 = vcmask (!%p426_p9), 982016  }
  0x15   : > { %4684 = vmatpush3.bf16.msra.mxu1 (!%p426_p9), %v4681_v7  ;;  %4667 = vmatprep.subr.msk.bf16.mxu0 (!%p426_p9), %vm5372_vm2, %v5369_v8  ;;  %v4691_v19 = vpack.c.bf16 (!%p426_p9), %v494_v16, %v493_v15  ;;  %v495_v22 = vld [vmem:[%s6320_s3 + $0x10] sm:$0xff] (!%p426_p9)  ;;  %v496_v23 = vld [vmem:[%s6320_s3 + $0x18] sm:$0xf] (!%p426_p9)  ;;  %v4675_v25 = vpack.c.bf16 (!%p426_p9), %v492_v21, %v491_v20  ;;  %v3634_v35 = vld [vmem:[%s6319_s2 + $0x40] sm:$0xff] (!%p426_p9)  ;;  %vm3435_vm11 = vcmask (!%p426_p9), 687104   ;;  %vm3512_vm12 = vcmask (!%p426_p9), 73728  }
  0x16   : > { %4687 = vmatprep.subr.msk.bf16.mxu1 (!%p426_p9), %vm5372_vm2, %v4685_v12  ;;  %v4695_v26 = vpack.c.bf16 (!%p426_p9), %v496_v23, %v495_v22  ;;  %v3635_v36 = vld [vmem:[%s6319_s2 + $0x48] sm:$0xff] (!%p426_p9)  ;;  %v3638_v37 = vld [vmem:[%s6320_s3 + $0x40] sm:$0xff] (!%p426_p9)  ;;  %v3636_v41 = vld [vmem:[%s6319_s2 + $0x50] sm:$0xff] (!%p426_p9) }
  0x17   : > { %v3639_v38 = vld [vmem:[%s6320_s3 + $0x48] sm:$0xff] (!%p426_p9)  ;;  %v4741_v39 = vpack.c.bf16 (!%p426_p9), %v3635_v36, %v3634_v35  ;;  %v3637_v42 = vld [vmem:[%s6319_s2 + $0x58] sm:$0xf] (!%p426_p9)  ;;  %v3640_v43 = vld [vmem:[%s6320_s3 + $0x50] sm:$0xff] (!%p426_p9) }
  0x18   : > { %s476_s20 = scalar_select %p475_p10, %s5321_s17, 1  ;;  %4670 = vmatpush3.bf16.msk.msra.mxu0 %vm5372_vm2, %v5369_v8  ;;  %v4751_v40 = vpack.c.bf16 %v3639_v38, %v3638_v37  ;;  %v3641_v44 = vld [vmem:[%s6320_s3 + $0x58] sm:$0xf]  ;;  %v4745_v45 = vpack.c.bf16 %v3637_v42, %v3636_v41  ;;  %v3654_v49 = vld [vmem:[%s6319_s2 + $0x60] sm:$0xff]  ;;  %v3655_v50 = vld [vmem:[%s6319_s2 + $0x68] sm:$0xff] }
  0x19   : > { %4690 = vmatpush3.bf16.msk.msra.mxu1 %vm5372_vm2, %v4685_v12  ;;  %4672 = vmatprep.subr.bf16.mxu0 %v4671_v17  ;;  %v4755_v46 = vpack.c.bf16 %v3641_v44, %v3640_v43  ;;  %v3658_v52 = vld [vmem:[%s6320_s3 + $0x60] sm:$0xff]  ;;  %v3659_v53 = vld [vmem:[%s6320_s3 + $0x68] sm:$0xff]  ;;  %v4781_v54 = vpack.c.bf16 %v3655_v50, %v3654_v49  ;;  %v3656_v56 = vld [vmem:[%s6319_s2 + $0x70] sm:$0xff]  ;;  %s5224_s17 = smov [#allocation2]  }
  0x1a   : > { %s3811_s27 = sshll.u32 %s476_s20, 4  ;;  %4692 = vmatprep.subr.bf16.mxu1 %v4691_v19  ;;  %v4791_v55 = vpack.c.bf16 %v3659_v53, %v3658_v52  ;;  %v3657_v57 = vld [vmem:[%s6319_s2 + $0x78] sm:$0xf]  ;;  %v3660_v58 = vld [vmem:[%s6320_s3 + $0x70] sm:$0xff]  ;;  %v3674_v0 = vld [vmem:[%s6319_s2 + $0x80] sm:$0xff] }
  0x1b   : > { %s484_s19 = scalar_lea.vmem %s6318_s1, %s3811_s27  ;;  %s479_s20 = scalar_lea.vmem %s6317_s0, %s3811_s27  ;;  %v3661_v59 = vld [vmem:[%s6320_s3 + $0x78] sm:$0xf]  ;;  %v4785_v60 = vpack.c.bf16 %v3657_v57, %v3656_v56  ;;  %v3675_v1 = vld [vmem:[%s6319_s2 + $0x88] sm:$0xff]  ;;  %v3680_v10 = vld [vmem:[%s6320_s3 + $0x90] sm:$0xff] }
  0x1c   : > { %v5405_v18 = vld [vmem:[%s484_s19] sm:$0xff]  ;;  %v5426_v24 = vld [vmem:[%s484_s19 + $0x8] sm:$0x3f]  ;;  %v4795_v61 = vpack.c.bf16 %v3661_v59, %v3660_v58  ;;  %v4821_v5 = vpack.c.bf16 %v3675_v1, %v3674_v0  ;;  %v3681_v11 = vld [vmem:[%s6320_s3 + $0x98] sm:$0xf]  ;;  %s473_s27 = sand.u32 1, %s5210_s30  }
  0x1d   : > { %4105 = vmatprep.mubr.msk.f32.mxu0 %vm507_vm3, %v5405_v18  ;;  %4127 = vmatprep.mubr.msk.f32.mxu1 %vm507_vm3, %v5405_v18  ;;  %v1974_v27 = vrot.slane %v5405_v18, 2  ;;  %v5436_v28 = vld [vmem:[%s479_s20] sm:$0xff]  ;;  %v5439_v29 = vrot.slane %v5426_v24, 2  ;;  %v5451_v31 = vld [vmem:[%s479_s20 + $0x8] sm:$0x3f]  ;;  %v1311_v47 = vrot.slane %v5405_v18, 1  ;;  %v4835_v13 = vpack.c.bf16 %v3681_v11, %v3680_v10 }
  0x1e   : > { %4106 = vmatmul.mubr.msk.f32.vlgmr.msra.gmra.mrb[0].mxu0 %vm507_vm3, %v5426_v24  ;;  %4128 = vmatmul.mubr.msk.f32.vlgmr.msra.gmra.mrb[0].mxu1 %vm507_vm3, %v5426_v24  ;;  %v834_v32 = vrot.slane %v5436_v28, 1  ;;  %v5457_v33 = vrot.slane %v5451_v31, 1  ;;  %v1312_v48 = vrot.slane %v5426_v24, 1  ;;  %v1643_v62 = vrot.slane %v5436_v28, 2  ;;  %v3679_v4 = vld [vmem:[%s6320_s3 + $0x88] sm:$0xff]  ;;  %v3696_v15 = vld [vmem:[%s6322_s5 + $0x50] sm:$0xff] }
  0x1f   : > { %4674 = vmatpush3.bf16.msra.mxu0 %v4671_v17  ;;  %4694 = vmatpush3.bf16.msra.mxu1 %v4691_v19  ;;  %v5447_v30 = vsel %vm1642_vm4, %v1974_v27, %v5439_v29  ;;  %v1644_v63 = vrot.slane %v5451_v31, 2  ;;  %v3695_v14 = vld [vmem:[%s6322_s5 + $0x48] sm:$0xff]  ;;  %v3697_v20 = vld [vmem:[%s6322_s5 + $0x58] sm:$0xff]  ;;  %v3698_v21 = vld [vmem:[%s6322_s5 + $0x60] sm:$0xff]  ;;  %s474_s26 = scalar_lea.vmem [#allocation2], %s473_s27  ;;  %s3515_s24 = scalar_lea.sflag [#allocation3], %s473_s27 }
  0x20   : > { %4677 = vmatprep.subr.msk.bf16.mxu0 %vm5372_vm2, %v4675_v25  ;;  %4697 = vmatprep.subr.msk.bf16.mxu1 %vm5372_vm2, %v4695_v26  ;;  %v836_v34 = vsel %vm833_vm5, %v834_v32, %v5457_v33  ;;  %v1313_v51 = vsel %vm833_vm5, %v1311_v47, %v1312_v48  ;;  %v3706_v16 = vld [vmem:[%s6323_s6 + $0x48] sm:$0xff]  ;;  %v4862_v9 = vpack.c.bf16 %v3696_v15, %v3695_v14  ;;  %v3708_v22 = vld [vmem:[%s6323_s6 + $0x58] sm:$0xff]  ;;  %v3700_v27 = vld [vmem:[%s6322_s5 + $0x70] sm:$0xff]  ;;  %s3527_s22 = sshll.u32 %s474_s26, 4  ;;  %s5160_s19 = sshll.u32 %s5224_s17, 4  ;;  %s6277_s22 = int_to_ptr.vmem [resolvable:$true] %s3527_s22  ;;  %s5161_s19 = int_to_ptr.vmem [resolvable:$false] %s5160_s19 }
  0x21   : > { %4116 = vmatprep.mubr.msk.f32.mxu0 %vm507_vm3, %v5436_v28  ;;  %4138 = vmatprep.mubr.msk.f32.mxu1 %vm507_vm3, %v5436_v28  ;;  %v1645_v2 = vsel %vm1642_vm4, %v1643_v62, %v1644_v63  ;;  %v4865_v23 = vpack.c.bf16 %v3698_v21, %v3697_v20  ;;  %v3710_v28 = vld [vmem:[%s6323_s6 + $0x68] sm:$0xff]  ;;  %v3701_v32 = vld [vmem:[%s6322_s5 + $0x78] sm:$0xff]  ;;  %v3713_v36 = vld [vmem:[%s6323_s6 + $0x80] sm:$0xff]  ;;  %s5156_s20 = scalar_lea.vmem %s6277_s22, 16  ;;  %s5162_s21 = scalar_lea.vmem %s5161_s19, 32 }
  0x22   : > { %v3703_v38 = vld [vmem:[%s6322_s5 + $0x88] sm:$0xff]  ;;  %v3694_v52 = vld [vmem:[%s6321_s4] ss:$0 sm:$0xff]  ;;  %v2164_v14 = vld [vmem:[%s6323_s6 + $0x18] sm:$0xff]  ;;  %p5157_p11 = scmp.ne.s32.totalorder %s6277_s22, %s5156_s20  ;;  %p5163_p0 = scmp.lt.s32.totalorder %s6277_s22, %s5161_s19 }
  0x23   : > { %4680 = vmatpush3.bf16.msk.msra.mxu0 %vm5372_vm2, %v4675_v25  ;;  %4700 = vmatpush3.bf16.msk.msra.mxu1 %vm5372_vm2, %v4695_v26  ;;  %v2152_v56 = vld [vmem:[%s6322_s5] sm:$0xff]  ;;  %v2153_v57 = vld [vmem:[%s6322_s5 + $0x8] sm:$0xff]  ;;  %p5164_p1 = scmp.lt.s32.totalorder %s5162_s21, %s5156_s20 }
  0x24   : > { %4702 = vmatprep.subr.bf16.mxu0 %v5358_v3  ;;  %4722 = vmatprep.subr.bf16.mxu1 %v4681_v7  ;;  %v2161_v59 = vld [vmem:[%s6323_s6] sm:$0xff]  ;;  %p5158_p12 = pnand %p5157_p11, %p5338_p5 }
  0x25   : > { %v2156_v21 = vld [vmem:[%s6322_s5 + $0x20] sm:$0xff]  ;;  %p5165_p2 = por %p5164_p1, %p5163_p0 }
  0x26   : > { %4117 = vmatmul.mubr.msk.f32.vlgmr.msra.gmra.mrb[0].mxu0 %vm507_vm3, %v5451_v31  ;;  %4139 = vmatmul.mubr.msk.f32.vlgmr.msra.gmra.mrb[0].mxu1 %vm507_vm3, %v5451_v31  ;;  %p5159_p13 = pneg %p5158_p12 }
  0x27   : > { %4704 = vmatpush3.bf16.msra.mxu0 %v5358_v3  ;;  %4724 = vmatpush3.bf16.msra.mxu1 %v4681_v7  ;;  %v3678_v3 = vld [vmem:[%s6320_s3 + $0x80] sm:$0xff]  ;;  %v3676_v7 = vld [vmem:[%s6319_s2 + $0x90] sm:$0xff] }
  0x28   : > { %4707 = vmatprep.subr.msk.bf16.mxu0 %vm5372_vm2, %v5369_v8  ;;  %4727 = vmatprep.subr.msk.bf16.mxu1 %vm5372_vm2, %v4685_v12  ;;  %v4831_v6 = vpack.c.bf16 %v3679_v4, %v3678_v3  ;;  %p5166_p3 = pnand %p5165_p2, %p5159_p13 }
  0x29   : > { %4149 = vmatprep.mubr.msk.f32.mxu0 %vm507_vm3, %v836_v34  ;;  %4171 = vmatprep.mubr.msk.f32.mxu1 %vm507_vm3, %v836_v34 }
  0x2b   : > { %4710 = vmatpush3.bf16.msk.msra.mxu0 %vm5372_vm2, %v5369_v8  ;;  %4730 = vmatpush3.bf16.msk.msra.mxu1 %vm5372_vm2, %v4685_v12  ;;  %v3677_v8 = vld [vmem:[%s6319_s2 + $0x98] sm:$0xf] }
  0x2c   : > { %4712 = vmatprep.subr.bf16.mxu0 %v4671_v17  ;;  %4732 = vmatprep.subr.bf16.mxu1 %v4691_v19  ;;  %v4825_v12 = vpack.c.bf16 %v3677_v8, %v3676_v7  ;;  %v2154_v7 = vld [vmem:[%s6322_s5 + $0x10] sm:$0xff] }
  0x2e   : > { %4150 = vmatmul.mubr.msk.f32.vlgmr.msra.gmra.mrb[2].mxu0 %vm507_vm3, %v5457_v33  ;;  %4172 = vmatmul.mubr.msk.f32.vlgmr.msra.gmra.mrb[2].mxu1 %vm507_vm3, %v5457_v33 }
  0x2f   : > { %4714 = vmatpush3.bf16.msra.mxu0 %v4671_v17  ;;  %4734 = vmatpush3.bf16.msra.mxu1 %v4691_v19  ;;  %v3707_v17 = vld [vmem:[%s6323_s6 + $0x50] sm:$0xff] }
  0x30   : > { %4717 = vmatprep.subr.msk.bf16.mxu0 %vm5372_vm2, %v4675_v25  ;;  %4737 = vmatprep.subr.msk.bf16.mxu1 %vm5372_vm2, %v4695_v26  ;;  %v4886_v19 = vpack.c.bf16 %v3707_v17, %v3706_v16 }
  0x31   : > { %4160 = vmatprep.mubr.msk.f32.mxu0 %vm507_vm3, %v5405_v18  ;;  %4182 = vmatprep.mubr.msk.f32.mxu1 %vm507_vm3, %v5405_v18  ;;  %v5221_v18 = vmov 0.0|0.0  }
  0x33   : > { %4720 = vmatpush3.bf16.msk.msra.mxu0 %vm5372_vm2, %v4675_v25  ;;  %4740 = vmatpush3.bf16.msk.msra.mxu1 %vm5372_vm2, %v4695_v26  ;;  %v3699_v26 = vld [vmem:[%s6322_s5 + $0x68] sm:$0xff] }
  0x34   : > { %4742 = vmatprep.subr.bf16.mxu0 %v4741_v39  ;;  %4752 = vmatprep.subr.bf16.mxu1 %v4751_v40 }
  0x36   : > { %4161 = vmatmul.mubr.msk.f32.vlgmr.msra.gmra.mrb[2].mxu0 %vm507_vm3, %v5426_v24  ;;  %4183 = vmatmul.mubr.msk.f32.vlgmr.msra.gmra.mrb[2].mxu1 %vm507_vm3, %v5426_v24  ;;  %v3709_v24 = vld [vmem:[%s6323_s6 + $0x60] sm:$0xff] }
  0x37   : > { %4744 = vmatpush3.bf16.msra.mxu0 %v4741_v39  ;;  %4754 = vmatpush3.bf16.msra.mxu1 %v4751_v40  ;;  %v4889_v25 = vpack.c.bf16 %v3709_v24, %v3708_v22  ;;  %v2157_v22 = vld [vmem:[%s6322_s5 + $0x28] sm:$0xff] }
  0x38   : > { %4747 = vmatprep.subr.msk.bf16.mxu0 %vm5372_vm2, %v4745_v45  ;;  %4757 = vmatprep.subr.msk.bf16.mxu1 %vm5372_vm2, %v4755_v46  ;;  %v2166_v24 = vld [vmem:[%s6323_s6 + $0x28] sm:$0xff] }
  0x39   : > { %4193 = vmatprep.mubr.msk.f32.mxu0 %vm507_vm3, %v836_v34  ;;  %4204 = vmatprep.mubr.msk.f32.mxu1 %vm507_vm3, %v836_v34  ;;  %v3712_v34 = vld [vmem:[%s6323_s6 + $0x78] sm:$0xff] }
  0x3a   : > { %v4895_v37 = vpack.c.bf16 %v3713_v36, %v3712_v34  ;;  %v3718_v34 = vld [vmem:[%s6322_s5 + $0x98] sm:$0xff] }
  0x3b   : > { %4750 = vmatpush3.bf16.msk.msra.mxu0 %vm5372_vm2, %v4745_v45  ;;  %4760 = vmatpush3.bf16.msk.msra.mxu1 %vm5372_vm2, %v4755_v46  ;;  %v3728_v36 = vld [vmem:[%s6323_s6 + $0x98] sm:$0xff] }
  0x3c   : > { %4762 = vmatprep.subr.bf16.mxu0 %v4741_v39  ;;  %4772 = vmatprep.subr.bf16.mxu1 %v4751_v40 }
  0x3e   : > { %4194 = vmatmul.mubr.msk.f32.vlgmr.msra.gmra.mrb[0].mxu0 %vm507_vm3, %v5457_v33  ;;  %4205 = vmatmul.mubr.msk.f32.vlgmr.msra.gmra.mrb[0].mxu1 %vm507_vm3, %v5457_v33  ;;  %v3702_v33 = vld [vmem:[%s6322_s5 + $0x80] sm:$0xff] }
  0x3f   : > { %4764 = vmatpush3.bf16.msra.mxu0 %v4741_v39  ;;  %4774 = vmatpush3.bf16.msra.mxu1 %v4751_v40  ;;  %v4871_v35 = vpack.c.bf16 %v3702_v33, %v3701_v32  ;;  %v5222_v39 = vmov 0.0   ;;  %v3714_v40 = vld [vmem:[%s6323_s6 + $0x88] sm:$0xff]  ;;  %v3717_v33 = vld [vmem:[%s6322_s5 + $0x90] sm:$0xff] }
  0x40   : > { %4767 = vmatprep.subr.msk.bf16.mxu0 %vm5372_vm2, %v4745_v45  ;;  %4777 = vmatprep.subr.msk.bf16.mxu1 %vm5372_vm2, %v4755_v46 }
  0x41   : > { %4215 = vmatprep.mubr.msk.f32.mxu0 %vm507_vm3, %v1313_v51  ;;  %4226 = vmatprep.mubr.msk.f32.mxu1 %vm507_vm3, %v1313_v51 }
  0x43   : > { %4770 = vmatpush3.bf16.msk.msra.mxu0 %vm5372_vm2, %v4745_v45  ;;  %4780 = vmatpush3.bf16.msk.msra.mxu1 %vm5372_vm2, %v4755_v46 }
  0x44   : > { %4782 = vmatprep.subr.bf16.mxu0 %v4781_v54  ;;  %4792 = vmatprep.subr.bf16.mxu1 %v4791_v55 }
  0x46   : > { %4216 = vmatmul.mubr.msk.f32.vlgmr.msra.gmra.mrb[2].mxu0 %vm507_vm3, %v1312_v48  ;;  %4227 = vmatmul.mubr.msk.f32.vlgmr.msra.gmra.mrb[2].mxu1 %vm507_vm3, %v1312_v48 }
  0x47   : > { %4784 = vmatpush3.bf16.msra.mxu0 %v4781_v54  ;;  %4794 = vmatpush3.bf16.msra.mxu1 %v4791_v55 }
  0x48   : > { %4787 = vmatprep.subr.msk.bf16.mxu0 %vm5372_vm2, %v4785_v60  ;;  %4797 = vmatprep.subr.msk.bf16.mxu1 %vm5372_vm2, %v4795_v61 }
  0x49   : > { %4237 = vmatprep.mubr.msk.f32.mxu0 %vm507_vm3, %v1313_v51  ;;  %4248 = vmatprep.mubr.msk.f32.mxu1 %vm507_vm3, %v1313_v51 }
  0x4b   : > { %4790 = vmatpush3.bf16.msk.msra.mxu0 %vm5372_vm2, %v4785_v60  ;;  %4800 = vmatpush3.bf16.msk.msra.mxu1 %vm5372_vm2, %v4795_v61 }
  0x4c   : > { %4802 = vmatprep.subr.bf16.mxu0 %v4781_v54  ;;  %4812 = vmatprep.subr.bf16.mxu1 %v4791_v55 }
  0x4e   : > { %4238 = vmatmul.mubr.msk.f32.vlgmr.msra.gmra.mrb[0].mxu0 %vm507_vm3, %v1312_v48  ;;  %4249 = vmatmul.mubr.msk.f32.vlgmr.msra.gmra.mrb[0].mxu1 %vm507_vm3, %v1312_v48 }
  0x4f   : > { %4804 = vmatpush3.bf16.msra.mxu0 %v4781_v54  ;;  %4814 = vmatpush3.bf16.msra.mxu1 %v4791_v55 }
  0x50   : > { %4807 = vmatprep.subr.msk.bf16.mxu0 %vm5372_vm2, %v4785_v60  ;;  %4817 = vmatprep.subr.msk.bf16.mxu1 %vm5372_vm2, %v4795_v61 }
  0x51   : > { %4259 = vmatprep.mubr.msk.f32.mxu0 %vm507_vm3, %v1645_v2  ;;  %4270 = vmatprep.mubr.msk.f32.mxu1 %vm507_vm3, %v1645_v2 }
  0x53   : > { %4810 = vmatpush3.bf16.msk.msra.mxu0 %vm5372_vm2, %v4785_v60  ;;  %4820 = vmatpush3.bf16.msk.msra.mxu1 %vm5372_vm2, %v4795_v61  ;;  %v2162_v60 = vld [vmem:[%s6323_s6 + $0x8] sm:$0xff] }
  0x54   : > { %4822 = vmatprep.subr.bf16.mxu0 %v4821_v5  ;;  %4832 = vmatprep.subr.bf16.mxu1 %v4831_v6  ;;  %v4898_v1 = vpack.c.bf16 %v2162_v60, %v2161_v59  ;;  %v3737_v60 = vld [vmem:[%s6322_s5 + $0xd8] sm:$0xff] }
  0x56   : > { %4260 = vmatmul.mubr.msk.f32.vlgmr.msra.gmra.mrb[2].mxu0 %vm507_vm3, %v1644_v63  ;;  %4271 = vmatmul.mubr.msk.f32.vlgmr.msra.gmra.mrb[2].mxu1 %vm507_vm3, %v1644_v63 }
  0x57   : > { %4824 = vmatpush3.bf16.msra.mxu0 %v4821_v5  ;;  %4834 = vmatpush3.bf16.msra.mxu1 %v4831_v6 }
  0x58   : > { %4827 = vmatprep.subr.msk.bf16.mxu0 %vm5372_vm2, %v4825_v12  ;;  %4837 = vmatprep.subr.msk.bf16.mxu1 %vm5372_vm2, %v4835_v13 }
  0x59   : > { %4281 = vmatprep.mubr.msk.f32.mxu0 %vm507_vm3, %v1645_v2  ;;  %4292 = vmatprep.mubr.msk.f32.mxu1 %vm507_vm3, %v1645_v2 }
  0x5b   : > { %4830 = vmatpush3.bf16.msk.msra.mxu0 %vm5372_vm2, %v4825_v12  ;;  %4840 = vmatpush3.bf16.msk.msra.mxu1 %vm5372_vm2, %v4835_v13 }
  0x5c   : > { %4842 = vmatprep.subr.bf16.mxu0 %v4821_v5  ;;  %4852 = vmatprep.subr.bf16.mxu1 %v4831_v6 }
  0x5e   : > { %4282 = vmatmul.mubr.msk.f32.vlgmr.msra.gmra.mrb[0].mxu0 %vm507_vm3, %v1644_v63  ;;  %4293 = vmatmul.mubr.msk.f32.vlgmr.msra.gmra.mrb[0].mxu1 %vm507_vm3, %v1644_v63  ;;  %v4874_v63 = vpack.c.bf16 %v2153_v57, %v2152_v56  ;;  %v3733_v56 = vld [vmem:[%s6323_s6 + $0xc0] sm:$0xff]  ;;  %v3734_v57 = vld [vmem:[%s6323_s6 + $0xc8] sm:$0xff] }
  0x5f   : > { %4844 = vmatpush3.bf16.msra.mxu0 %v4821_v5  ;;  %4854 = vmatpush3.bf16.msra.mxu1 %v4831_v6  ;;  %v4931_v59 = vpack.c.bf16 %v3734_v57, %v3733_v56  ;;  %v3775_v56 = vld [vmem:[%s6323_s6 + $0x160] sm:$0xff] }
  0x60   : > { %4847 = vmatprep.subr.msk.bf16.mxu0 %vm5372_vm2, %v4825_v12  ;;  %4857 = vmatprep.subr.msk.bf16.mxu1 %vm5372_vm2, %v4835_v13 }
  0x61   : > { %4303 = vmatprep.mubr.msk.f32.mxu0 %vm507_vm3, %v5447_v30  ;;  %4314 = vmatprep.mubr.msk.f32.mxu1 %vm507_vm3, %v5447_v30  ;;  %v3711_v30 = vld [vmem:[%s6323_s6 + $0x70] sm:$0xff] }
  0x62   : > { %v4892_v31 = vpack.c.bf16 %v3711_v30, %v3710_v28  ;;  %v2159_v28 = vld [vmem:[%s6322_s5 + $0x38] sm:$0xff] }
  0x63   : > { %4850 = vmatpush3.bf16.msk.msra.mxu0 %vm5372_vm2, %v4825_v12  ;;  %4860 = vmatpush3.bf16.msk.msra.mxu1 %vm5372_vm2, %v4835_v13  ;;  %v2155_v12 = vld [vmem:[%s6322_s5 + $0x18] sm:$0xff]  ;;  %v2163_v13 = vld [vmem:[%s6323_s6 + $0x10] sm:$0xff] }
  0x64   : > { %4861 = vmatprep.subr.bf16.mxu0 %v5221_v18  ;;  %4885 = vmatprep.subr.bf16.mxu1 %v5221_v18  ;;  %v4901_v20 = vpack.c.bf16 %v2164_v14, %v2163_v13  ;;  %v2168_v30 = vld [vmem:[%s6323_s6 + $0x38] sm:$0xff]  ;;  %v3752_v14 = vld [vmem:[%s6323_s6 + $0x100] sm:$0xff] }
  0x65   : > { %v3751_v13 = vld [vmem:[%s6323_s6 + $0xf8] sm:$0xff] }
  0x66   : > { %4304 = vmatmul.mubr.msk.f32.vlgmr.msra.gmra.mrb[2].mxu0 %vm507_vm3, %v5439_v29  ;;  %4315 = vmatmul.mubr.msk.f32.vlgmr.msra.gmra.mrb[2].mxu1 %vm507_vm3, %v5439_v29  ;;  %v4868_v29 = vpack.c.bf16 %v3700_v27, %v3699_v26  ;;  %v2158_v27 = vld [vmem:[%s6322_s5 + $0x30] sm:$0xff] }
  0x67   : > { %4863 = vmatpush3.bf16.msra.mxu0 %v4862_v9  ;;  %4887 = vmatpush3.bf16.msra.mxu1 %v4886_v19  ;;  %v4877_v19 = vpack.c.bf16 %v2155_v12, %v2154_v7  ;;  %v3750_v7 = vld [vmem:[%s6323_s6 + $0xf0] sm:$0xff]  ;;  %v3742_v12 = vld [vmem:[%s6322_s5 + $0x100] sm:$0xff] }
  0x68   : > { %4864 = vmatprep.subr.bf16.mxu0 %v5221_v18  ;;  %4888 = vmatprep.subr.bf16.mxu1 %v5221_v18 }
  0x69   : > { %4335 = vmatprep.mubr.msk.f32.mxu0 %vm5223_vm6, %v5222_v39  ;;  %4377 = vmatprep.mubr.msk.f32.mxu1 %vm5223_vm6, %v5222_v39 }
  0x6b   : > { %4866 = vmatpush3.bf16.msra.mxu0 %v4865_v23  ;;  %4890 = vmatpush3.bf16.msra.mxu1 %v4889_v25  ;;  %v2165_v23 = vld [vmem:[%s6323_s6 + $0x20] sm:$0xff]  ;;  %v4880_v25 = vpack.c.bf16 %v2157_v22, %v2156_v21  ;;  %v3753_v21 = vld [vmem:[%s6323_s6 + $0x108] sm:$0xff]  ;;  %v3754_v22 = vld [vmem:[%s6323_s6 + $0x110] sm:$0xff] }
  0x6c   : > { %4867 = vmatprep.subr.bf16.mxu0 %v5221_v18  ;;  %4891 = vmatprep.subr.bf16.mxu1 %v5221_v18  ;;  %v4904_v26 = vpack.c.bf16 %v2166_v24, %v2165_v23  ;;  %v4955_v24 = vpack.c.bf16 %v3754_v22, %v3753_v21 }
  0x6f   : > { %4869 = vmatpush3.bf16.msra.mxu0 %v4868_v29  ;;  %4893 = vmatpush3.bf16.msra.mxu1 %v4892_v31  ;;  %v2167_v29 = vld [vmem:[%s6323_s6 + $0x30] sm:$0xff]  ;;  %v4883_v31 = vpack.c.bf16 %v2159_v28, %v2158_v27  ;;  %v3767_v27 = vld [vmem:[%s6323_s6 + $0x120] sm:$0xff]  ;;  %v3768_v28 = vld [vmem:[%s6323_s6 + $0x128] sm:$0xff] }
  0x70   : > { %4870 = vmatprep.subr.bf16.mxu0 %v5221_v18  ;;  %4894 = vmatprep.subr.bf16.mxu1 %v5221_v18  ;;  %v4907_v32 = vpack.c.bf16 %v2168_v30, %v2167_v29  ;;  %v3745_v29 = vld [vmem:[%s6322_s5 + $0x118] sm:$0xff] }
  0x71   : > { %v3755_v30 = vld [vmem:[%s6323_s6 + $0x118] sm:$0xff] }
  0x73   : > { %4872 = vmatpush3.bf16.msra.mxu0 %v4871_v35  ;;  %4896 = vmatpush3.bf16.msra.mxu1 %v4895_v37  ;;  %v3727_v35 = vld [vmem:[%s6323_s6 + $0x90] sm:$0xff]  ;;  %v2160_v37 = vld [vmem:[%s6322_s5 + $0x40] sm:$0xff] }
  0x74   : > { %4333 = vmatprep.subr.mxu0 %v5222_v39  ;;  %4375 = vmatprep.subr.mxu1 %v5222_v39 }
  0x77   : > { %4334 = vmatpush3.msra.mxu0 %v3703_v38  ;;  %4376 = vmatpush3.msra.mxu1 %v3714_v40  ;;  %v2169_v38 = vld [vmem:[%s6323_s6 + $0x40] sm:$0xff]  ;;  %v4910_v40 = vpack.c.bf16 %v3718_v34, %v3717_v33  ;;  %v3759_v33 = vld [vmem:[%s6322_s5 + $0x130] sm:$0xff]  ;;  %v3760_v34 = vld [vmem:[%s6322_s5 + $0x138] sm:$0xff] }
  0x78   : > { %4873 = vmatprep.subr.bf16.mxu0 %v5221_v18  ;;  %4897 = vmatprep.subr.bf16.mxu1 %v5221_v18 }
 0x131   : > { %v4283_v41 = vpop.f32.mrb[0].mxu0  ;;  %v4294_v42 = vpop.f32.mrb[0].mxu1 }
 0x132   : > { %v1883_v43 = vpop.f32.mrb[1].mxu0  ;;  %v2136_v44 = vmax.f32 %v4283_v41, %v4294_v42  ;;  %v1963_v45 = vpop.f32.mrb[1].mxu1  ;;  %v4922_v41 = vpack.c.bf16 %v3728_v36, %v3727_v35  ;;  %v3719_v42 = vld [vmem:[%s6322_s5 + $0xa0] sm:$0xff]  ;;  %v3769_v35 = vld [vmem:[%s6323_s6 + $0x130] sm:$0xff]  ;;  %v3770_v36 = vld [vmem:[%s6323_s6 + $0x138] sm:$0xff] }
 0x133   : > { %v2135_v46 = vmax.f32 %v1883_v43, %v1963_v45  ;;  %v3720_v43 = vld [vmem:[%s6322_s5 + $0xa8] sm:$0xff] }
 0x134   : > { %v3730_v45 = vld [vmem:[%s6323_s6 + $0xa8] sm:$0xff] }
 0x139   : > { %v4305_v47 = vpop.f32.mrb[2].mxu0  ;;  %v4316_v48 = vpop.f32.mrb[2].mxu1 }
 0x13a   : > { %v2047_v49 = vpop.f32.mrb[3].mxu0  ;;  %v2138_v50 = vmax.f32 %v4305_v47, %v4316_v48  ;;  %v2124_v51 = vpop.f32.mrb[3].mxu1  ;;  %v3721_v48 = vld [vmem:[%s6322_s5 + $0xb0] sm:$0xff] }
 0x13b   : > { %v2137_v53 = vmax.f32 %v2047_v49, %v2124_v51  ;;  %v3722_v49 = vld [vmem:[%s6322_s5 + $0xb8] sm:$0xff] }
 0x13c   : > { %v2140_v54 = vmax.f32 %v2136_v44, %v2138_v50  ;;  %v3729_v44 = vld [vmem:[%s6323_s6 + $0xa0] sm:$0xff]  ;;  %v3731_v50 = vld [vmem:[%s6323_s6 + $0xb0] sm:$0xff]  ;;  %v3732_v51 = vld [vmem:[%s6323_s6 + $0xb8] sm:$0xff] }
 0x13d   : > { %v2139_v55 = vmax.f32 %v2135_v46, %v2137_v53  ;;  %v4913_v46 = vpack.c.bf16 %v3720_v43, %v3719_v42  ;;  %v4925_v47 = vpack.c.bf16 %v3730_v45, %v3729_v44  ;;  %v4928_v53 = vpack.c.bf16 %v3732_v51, %v3731_v50  ;;  %v3772_v42 = vld [vmem:[%s6323_s6 + $0x148] sm:$0xff]  ;;  %v3763_v45 = vld [vmem:[%s6322_s5 + $0x150] sm:$0xff]  ;;  %v2990_v51 = vld [vmem:[%s6325_s8] sm:$0xff] }
 0x13e   : > { %v2149_v58 = vadd.f32 %v3694_v52, %v2140_v54  ;;  %v3723_v54 = vld [vmem:[%s6322_s5 + $0xc0] sm:$0xff] }
 0x13f   : > { %v2148_v61 = vadd.f32 %v3694_v52, %v2139_v55  ;;  %v4916_v52 = vpack.c.bf16 %v3722_v49, %v3721_v48  ;;  %v3724_v55 = vld [vmem:[%s6322_s5 + $0xc8] sm:$0xff]  ;;  %v3774_v48 = vld [vmem:[%s6323_s6 + $0x158] sm:$0xff] }
 0x140   : > { %v2151_v62 = vmax.f32 %v2149_v58, 0.0  ;;  %v4919_v58 = vpack.c.bf16 %v3724_v55, %v3723_v54  ;;  %v3778_v54 = vld [vmem:[%s6325_s8 + $0x48] sm:$0xff]  ;;  %v3765_v55 = vld [vmem:[%s6322_s5 + $0x160] sm:$0xff] }
 0x141   : > { %v5746_v0 = vmax.f32 %v2148_v61, 0.0  ;;  %v3738_v61 = vld [vmem:[%s6322_s5 + $0xe0] sm:$0xff] }
 0x142   : > { %v2183_v2 = vrot.slane %v2151_v62, 1  ;;  %v2491_v3 = vrot.slane %v2151_v62, 2  ;;  %v2659_v4 = vrot.slane %v2151_v62, 3  ;;  %v2826_v5 = vrot.slane %v2151_v62, 4  ;;  %v3747_v62 = vld [vmem:[%s6323_s6 + $0xd8] sm:$0xff] }
 0x143   : > { %v2182_v6 = vrot.slane %v5746_v0, 1  ;;  %v2490_v8 = vrot.slane %v5746_v0, 2  ;;  %v2658_v10 = vrot.slane %v5746_v0, 3  ;;  %v2825_v11 = vrot.slane %v5746_v0, 4 }
 0x145   : > { %v2184_v15 = vsel %vm833_vm5, %v2182_v6, %v2183_v2  ;;  %v5766_v16 = vsel %vm1642_vm4, %v2490_v8, %v2491_v3  ;;  %v5768_v9 = vsel %vm2657_vm8, %v2658_v10, %v2659_v4  ;;  %v5771_v17 = vsel %vm514_vm0, %v2825_v11, %v2826_v5  ;;  %v3739_v4 = vld [vmem:[%s6322_s5 + $0xe8] sm:$0xff]  ;;  %v3740_v5 = vld [vmem:[%s6322_s5 + $0xf0] sm:$0xff]  ;;  %v3741_v11 = vld [vmem:[%s6322_s5 + $0xf8] sm:$0xff] }
 0x146   : > { %4336 = vmatmul.mubr.msk.f32.vlgmr.msra.gmra.mrb[4].mxu0 %vm2185_vm7, %v2184_v15  ;;  %4378 = vmatmul.mubr.msk.f32.vlgmr.msra.gmra.mrb[4].mxu1 %vm2185_vm7, %v2184_v15  ;;  %v4934_v2 = vpack.c.bf16 %v3738_v61, %v3737_v60  ;;  %v3749_v6 = vld [vmem:[%s6323_s6 + $0xe8] sm:$0xff]  ;;  %v4937_v8 = vpack.c.bf16 %v3740_v5, %v3739_v4  ;;  %v4940_v15 = vpack.c.bf16 %v3742_v12, %v3741_v11  ;;  %v2993_v60 = vld [vmem:[%s6325_s8 + $0x18] sm:$0xff] }
 0x147   : > { %4875 = vmatpush3.bf16.msra.mxu0 %v4874_v63  ;;  %4899 = vmatpush3.bf16.msra.mxu1 %v4898_v1  ;;  %v3748_v63 = vld [vmem:[%s6323_s6 + $0xe0] sm:$0xff]  ;;  %v3735_v1 = vld [vmem:[%s6323_s6 + $0xd0] sm:$0xff]  ;;  %v4949_v10 = vpack.c.bf16 %v3750_v7, %v3749_v6  ;;  %v3782_v4 = vld [vmem:[%s6325_s8 + $0x68] sm:$0xff] }
 0x148   : > { %4876 = vmatprep.subr.bf16.mxu0 %v5221_v18  ;;  %4900 = vmatprep.subr.bf16.mxu1 %v5221_v18  ;;  %v4946_v3 = vpack.c.bf16 %v3748_v63, %v3747_v62  ;;  %v3780_v62 = vld [vmem:[%s6325_s8 + $0x58] sm:$0xff]  ;;  %v2996_v6 = vld [vmem:[%s6325_s8 + $0x30] sm:$0xff] }
 0x149   : > { %4356 = vmatprep.mubr.msk.f32.mxu0 %vm5223_vm6, %v5222_v39  ;;  %4398 = vmatprep.mubr.msk.f32.mxu1 %vm5223_vm6, %v5222_v39  ;;  %v2997_v7 = vld [vmem:[%s6325_s8 + $0x38] sm:$0xff] }
 0x14a   : > { %v3784_v11 = vld [vmem:[%s6325_s8 + $0x78] sm:$0xff] }
 0x14b   : > { %4878 = vmatpush3.bf16.msra.mxu0 %v4877_v19  ;;  %4902 = vmatpush3.bf16.msra.mxu1 %v4901_v20  ;;  %v3743_v19 = vld [vmem:[%s6322_s5 + $0x108] sm:$0xff]  ;;  %v3744_v20 = vld [vmem:[%s6322_s5 + $0x110] sm:$0xff] }
 0x14c   : > { %4879 = vmatprep.subr.bf16.mxu0 %v5221_v18  ;;  %4903 = vmatprep.subr.bf16.mxu1 %v5221_v18  ;;  %v4943_v23 = vpack.c.bf16 %v3744_v20, %v3743_v19  ;;  %v2987_v20 = vld [vmem:[%s6324_s7] sm:$0x1] }
 0x14f   : > { %4881 = vmatpush3.bf16.msra.mxu0 %v4880_v25  ;;  %4905 = vmatpush3.bf16.msra.mxu1 %v4904_v26  ;;  %v3757_v25 = vld [vmem:[%s6322_s5 + $0x120] sm:$0xff]  ;;  %v3758_v26 = vld [vmem:[%s6322_s5 + $0x128] sm:$0xff] }
 0x150   : > { %4882 = vmatprep.subr.bf16.mxu0 %v5221_v18  ;;  %4906 = vmatprep.subr.bf16.mxu1 %v5221_v18 }
 0x153   : > { %4884 = vmatpush3.bf16.msra.mxu0 %v4883_v31  ;;  %4908 = vmatpush3.bf16.msra.mxu1 %v4907_v32  ;;  %v4958_v31 = vpack.c.bf16 %v3758_v26, %v3757_v25  ;;  %v4970_v32 = vpack.c.bf16 %v3768_v28, %v3767_v27  ;;  %v3796_v27 = vld [vmem:[%s6325_s8 + $0xc0] sm:$0xff]  ;;  %v3797_v28 = vld [vmem:[%s6325_s8 + $0xc8] sm:$0xff] }
 0x154   : > { %4354 = vmatprep.subr.mxu0 %v5222_v39  ;;  %4396 = vmatprep.subr.mxu1 %v5222_v39 }
 0x157   : > { %4355 = vmatpush3.msra.mxu0 %v2160_v37  ;;  %4397 = vmatpush3.msra.mxu1 %v2169_v38  ;;  %v4961_v37 = vpack.c.bf16 %v3760_v34, %v3759_v33  ;;  %v4973_v38 = vpack.c.bf16 %v3770_v36, %v3769_v35  ;;  %v5018_v33 = vpack.c.bf16 %v3797_v28, %v3796_v27  ;;  %v3798_v36 = vld [vmem:[%s6325_s8 + $0xd0] sm:$0xff]  ;;  %v3430_v28 = vld [vmem:[%s6329_s12 + $0x38] sm:$0xff] }
 0x158   : > { %4357 = vmatmul.mubr.msk.f32.vlgmr.msra.gmra.mrb[4].mxu0 %vm2185_vm7, %v5746_v0  ;;  %4399 = vmatmul.mubr.msk.f32.vlgmr.msra.gmra.mrb[4].mxu1 %vm2185_vm7, %v5746_v0  ;;  %v3725_v0 = vld [vmem:[%s6322_s5 + $0xd0] sm:$0xff] }
 0x159   : > { %4909 = vmatprep.subr.bf16.mxu0 %v5221_v18  ;;  %4921 = vmatprep.subr.bf16.mxu1 %v5221_v18  ;;  %v3429_v27 = vld [vmem:[%s6329_s12 + $0x30] sm:$0xff] }
 0x15a   : > { %4911 = vmatpush3.bf16.msra.mxu0 %v4910_v40  ;;  %4923 = vmatpush3.bf16.msra.mxu1 %v4922_v41  ;;  %v3761_v40 = vld [vmem:[%s6322_s5 + $0x140] sm:$0xff] }
 0x15b   : > { %4912 = vmatprep.subr.bf16.mxu0 %v5221_v18  ;;  %4924 = vmatprep.subr.bf16.mxu1 %v5221_v18  ;;  %v3771_v41 = vld [vmem:[%s6323_s6 + $0x140] sm:$0xff] }
 0x15c   : > { %4419 = vmatprep.mubr.msk.f32.mxu0 %vm5223_vm6, %v5222_v39  ;;  %4440 = vmatprep.mubr.msk.f32.mxu1 %vm5223_vm6, %v5222_v39  ;;  %v4976_v44 = vpack.c.bf16 %v3772_v42, %v3771_v41  ;;  %v3790_v41 = vld [vmem:[%s6325_s8 + $0x98] sm:$0xff] }
 0x15e   : > { %4914 = vmatpush3.bf16.msra.mxu0 %v4913_v46  ;;  %4926 = vmatpush3.bf16.msra.mxu1 %v4925_v47  ;;  %v3764_v46 = vld [vmem:[%s6322_s5 + $0x158] sm:$0xff]  ;;  %v3773_v47 = vld [vmem:[%s6323_s6 + $0x150] sm:$0xff] }
 0x15f   : > { %4915 = vmatprep.subr.bf16.mxu0 %v5221_v18  ;;  %4927 = vmatprep.subr.bf16.mxu1 %v5221_v18  ;;  %v4967_v49 = vpack.c.bf16 %v3764_v46, %v3763_v45  ;;  %v4979_v50 = vpack.c.bf16 %v3774_v48, %v3773_v47  ;;  %v3791_v46 = vld [vmem:[%s6325_s8 + $0xa0] sm:$0xff]  ;;  %v3792_v47 = vld [vmem:[%s6325_s8 + $0xa8] sm:$0xff] }
 0x162   : > { %4917 = vmatpush3.bf16.msra.mxu0 %v4916_v52  ;;  %4929 = vmatpush3.bf16.msra.mxu1 %v4928_v53  ;;  %v2991_v52 = vld [vmem:[%s6325_s8 + $0x8] sm:$0xff]  ;;  %v3777_v53 = vld [vmem:[%s6325_s8 + $0x40] sm:$0xff] }
 0x163   : > { %4918 = vmatprep.subr.bf16.mxu0 %v5221_v18  ;;  %4930 = vmatprep.subr.bf16.mxu1 %v5221_v18  ;;  %v4994_v57 = vpack.c.bf16 %v2991_v52, %v2990_v51  ;;  %v5012_v51 = vpack.c.bf16 %v3792_v47, %v3791_v46  ;;  %v3793_v52 = vld [vmem:[%s6325_s8 + $0xb0] sm:$0xff]  ;;  %v3347_v47 = vld [vmem:[%s6328_s11] sm:$0x1] }
 0x164   : > { %v3433_v46 = vld [vmem:[%s6329_s12 + $0x50] sm:$0xf] }
 0x166   : > { %4920 = vmatpush3.bf16.msra.mxu0 %v4919_v58  ;;  %4932 = vmatpush3.bf16.msra.mxu1 %v4931_v59  ;;  %v4982_v58 = vpack.c.bf16 %v3778_v54, %v3777_v53  ;;  %v2992_v59 = vld [vmem:[%s6325_s8 + $0x10] sm:$0xff]  ;;  %v3794_v53 = vld [vmem:[%s6325_s8 + $0xb8] sm:$0xff] }
 0x167   : > { %4417 = vmatprep.subr.mxu0 %v5222_v39  ;;  %4438 = vmatprep.subr.mxu1 %v5222_v39  ;;  %v4997_v61 = vpack.c.bf16 %v2993_v60, %v2992_v59 }
 0x16a   : > { %4418 = vmatpush3.msra.mxu0 %v3725_v0  ;;  %4439 = vmatpush3.msra.mxu1 %v3735_v1  ;;  %v2994_v0 = vld [vmem:[%s6325_s8 + $0x20] sm:$0xff]  ;;  %v2995_v1 = vld [vmem:[%s6325_s8 + $0x28] sm:$0xff] }
 0x16b   : > { %4420 = vmatmul.mubr.msk.f32.vlgmr.msra.gmra.mrb[4].mxu0 %vm2185_vm7, %v5766_v16  ;;  %4441 = vmatmul.mubr.msk.f32.vlgmr.msra.gmra.mrb[4].mxu1 %vm2185_vm7, %v5766_v16  ;;  %v4952_v16 = vpack.c.bf16 %v3752_v14, %v3751_v13  ;;  %v2999_v13 = vlaneseq }
 0x16c   : > { %4933 = vmatprep.subr.bf16.mxu0 %v5221_v18  ;;  %4945 = vmatprep.subr.bf16.mxu1 %v5221_v18 }
 0x16d   : > { %4935 = vmatpush3.bf16.msra.mxu0 %v4934_v2  ;;  %4947 = vmatpush3.bf16.msra.mxu1 %v4946_v3  ;;  %v5000_v2 = vpack.c.bf16 %v2995_v1, %v2994_v0  ;;  %v3781_v3 = vld [vmem:[%s6325_s8 + $0x60] sm:$0xff]  ;;  %v3000_v14 = vshrl.u32 %v2999_v13, 7  ;;  %v3337_v0 = vld [vmem:[%s6327_s10 + $0x28] sm:$0xff]  ;;  %v3338_v1 = vld [vmem:[%s6327_s10 + $0x30] sm:$0xff] }
 0x16e   : > { %4936 = vmatprep.subr.bf16.mxu0 %v5221_v18  ;;  %4948 = vmatprep.subr.bf16.mxu1 %v5221_v18  ;;  %v4988_v5 = vpack.c.bf16 %v3782_v4, %v3781_v3  ;;  %v3339_v3 = vld [vmem:[%s6327_s10 + $0x38] sm:$0xff]  ;;  %v3345_v13 = vld [vmem:[%s6327_s10 + $0x68] sm:$0xff] }
 0x16f   : > { %4461 = vmatprep.mubr.msk.f32.mxu0 %vm5223_vm6, %v5222_v39  ;;  %4482 = vmatprep.mubr.msk.f32.mxu1 %vm5223_vm6, %v5222_v39  ;;  %v5039_v4 = vpack.c.bf16 %v3339_v3, %v3338_v1 }
 0x171   : > { %4938 = vmatpush3.bf16.msra.mxu0 %v4937_v8  ;;  %4950 = vmatpush3.bf16.msra.mxu1 %v4949_v10  ;;  %v5003_v8 = vpack.c.bf16 %v2997_v7, %v2996_v6  ;;  %v3783_v10 = vld [vmem:[%s6325_s8 + $0x70] sm:$0xff]  ;;  %v3341_v6 = vld [vmem:[%s6327_s10 + $0x48] sm:$0xff] }
 0x172   : > { %4939 = vmatprep.subr.bf16.mxu0 %v5221_v18  ;;  %4951 = vmatprep.subr.bf16.mxu1 %v5221_v18  ;;  %v4991_v12 = vpack.c.bf16 %v3784_v11, %v3783_v10  ;;  %v3343_v10 = vld [vmem:[%s6327_s10 + $0x58] sm:$0xff] }
 0x175   : > { %4941 = vmatpush3.bf16.msra.mxu0 %v4940_v15  ;;  %4953 = vmatpush3.bf16.msra.mxu1 %v4952_v16  ;;  %v3001_v15 = vsub.s32 0, %v3000_v14 }
 0x176   : > { %4942 = vmatprep.subr.bf16.mxu0 %v5221_v18  ;;  %4954 = vmatprep.subr.bf16.mxu1 %v5221_v18 }
 0x177   : > { %v3002_v25 = vrot.slane %v2987_v20, %v3001_v15  ;;  %v3346_v15 = vld [vmem:[%s6327_s10 + $0x70] sm:$0xff] }
 0x179   : > { %4944 = vmatpush3.bf16.msra.mxu0 %v4943_v23  ;;  %4956 = vmatpush3.bf16.msra.mxu1 %v4955_v24 }
 0x17a   : > { %4459 = vmatprep.subr.mxu0 %v5222_v39  ;;  %4480 = vmatprep.subr.mxu1 %v5222_v39 }
 0x17d   : > { %4460 = vmatpush3.msra.mxu0 %v3745_v29  ;;  %4481 = vmatpush3.msra.mxu1 %v3755_v30 }
 0x17e   : > { %4462 = vmatmul.mubr.msk.f32.vlgmr.msra.gmra.mrb[4].mxu0 %vm2185_vm7, %v5768_v9  ;;  %4483 = vmatmul.mubr.msk.f32.vlgmr.msra.gmra.mrb[4].mxu1 %vm2185_vm7, %v5768_v9  ;;  %v3762_v9 = vld [vmem:[%s6322_s5 + $0x148] sm:$0xff] }
 0x17f   : > { %4957 = vmatprep.subr.bf16.mxu0 %v5221_v18  ;;  %4969 = vmatprep.subr.bf16.mxu1 %v5221_v18  ;;  %v4964_v43 = vpack.c.bf16 %v3762_v9, %v3761_v40  ;;  %v3789_v9 = vld [vmem:[%s6325_s8 + $0x90] sm:$0xff] }
 0x180   : > { %4959 = vmatpush3.bf16.msra.mxu0 %v4958_v31  ;;  %4971 = vmatpush3.bf16.msra.mxu1 %v4970_v32  ;;  %v3787_v31 = vld [vmem:[%s6325_s8 + $0x80] sm:$0xff]  ;;  %v3788_v32 = vld [vmem:[%s6325_s8 + $0x88] sm:$0xff]  ;;  %v5009_v45 = vpack.c.bf16 %v3790_v41, %v3789_v9 }
 0x181   : > { %4960 = vmatprep.subr.bf16.mxu0 %v5221_v18  ;;  %4972 = vmatprep.subr.bf16.mxu1 %v5221_v18  ;;  %v3329_v9 = vld [vmem:[%s6326_s9] sm:$0x1] }
 0x182   : > { %4503 = vmatprep.mubr.msk.f32.mxu0 %vm5223_vm6, %v5222_v39  ;;  %4524 = vmatprep.mubr.msk.f32.mxu1 %vm5223_vm6, %v5222_v39 }
 0x184   : > { %4962 = vmatpush3.bf16.msra.mxu0 %v4961_v37  ;;  %4974 = vmatpush3.bf16.msra.mxu1 %v4973_v38  ;;  %v3799_v37 = vld [vmem:[%s6325_s8 + $0xd8] sm:$0xff]  ;;  %v5006_v38 = vpack.c.bf16 %v3788_v32, %v3787_v31 }
 0x185   : > { %4963 = vmatprep.subr.bf16.mxu0 %v5221_v18  ;;  %4975 = vmatprep.subr.bf16.mxu1 %v5221_v18  ;;  %v5021_v42 = vpack.c.bf16 %v3799_v37, %v3798_v36 }
 0x188   : > { %4965 = vmatpush3.bf16.msra.mxu0 %v4964_v43  ;;  %4977 = vmatpush3.bf16.msra.mxu1 %v4976_v44  ;;  %v3800_v43 = vld [vmem:[%s6325_s8 + $0xe0] sm:$0xff]  ;;  %v3801_v44 = vld [vmem:[%s6325_s8 + $0xe8] sm:$0xff] }
 0x189   : > { %4966 = vmatprep.subr.bf16.mxu0 %v5221_v18  ;;  %4978 = vmatprep.subr.bf16.mxu1 %v5221_v18  ;;  %v5024_v48 = vpack.c.bf16 %v3801_v44, %v3800_v43  ;;  %v3432_v44 = vld [vmem:[%s6329_s12 + $0x48] sm:$0xff] }
 0x18c   : > { %4968 = vmatpush3.bf16.msra.mxu0 %v4967_v49  ;;  %4980 = vmatpush3.bf16.msra.mxu1 %v4979_v50  ;;  %v3802_v49 = vld [vmem:[%s6325_s8 + $0xf0] sm:$0xff]  ;;  %v3803_v50 = vld [vmem:[%s6325_s8 + $0xf8] sm:$0xff] }
 0x18d   : > { %4501 = vmatprep.subr.mxu0 %v5222_v39  ;;  %4522 = vmatprep.subr.mxu1 %v5222_v39  ;;  %v5027_v54 = vpack.c.bf16 %v3803_v50, %v3802_v49 }
 0x190   : > { %4502 = vmatpush3.msra.mxu0 %v3765_v55  ;;  %4523 = vmatpush3.msra.mxu1 %v3775_v56  ;;  %v5015_v55 = vpack.c.bf16 %v3794_v53, %v3793_v52  ;;  %v3332_v56 = vld [vmem:[%s6327_s10] sm:$0xff] }
 0x191   : > { %4504 = vmatmul.mubr.msk.f32.vlgmr.msra.gmra.mrb[4].mxu0 %vm2185_vm7, %v5771_v17  ;;  %4525 = vmatmul.mubr.msk.f32.vlgmr.msra.gmra.mrb[4].mxu1 %vm2185_vm7, %v5771_v17  ;;  %v3779_v17 = vld [vmem:[%s6325_s8 + $0x50] sm:$0xff] }
 0x192   : > { %4993 = vmatprep.subr.bf16.mxu1 %v5221_v18  ;;  %4981 = vmatprep.subr.bf16.mxu0 %v5221_v18  ;;  %v4985_v63 = vpack.c.bf16 %v3780_v62, %v3779_v17  ;;  %v3335_v17 = vld [vmem:[%s6327_s10 + $0x18] sm:$0xff] }
 0x193   : > { %4995 = vmatpush3.bf16.msra.mxu1 %v4994_v57  ;;  %4983 = vmatpush3.bf16.msra.mxu0 %v4982_v58  ;;  %v3333_v57 = vld [vmem:[%s6327_s10 + $0x8] sm:$0xff] }
 0x194   : > { %4996 = vmatprep.subr.bf16.mxu1 %v5221_v18  ;;  %4984 = vmatprep.subr.bf16.mxu0 %v5221_v18  ;;  %v5030_v59 = vpack.c.bf16 %v3333_v57, %v3332_v56 }
 0x195   : > { %4562 = vmatprep.mubr.msk.f32.mxu1 %vm5223_vm6, %v5222_v39  ;;  %4543 = vmatprep.mubr.msk.f32.mxu0 %vm5223_vm6, %v5222_v39 }
 0x197   : > { %4998 = vmatpush3.bf16.msra.mxu1 %v4997_v61  ;;  %4986 = vmatpush3.bf16.msra.mxu0 %v4985_v63  ;;  %v3334_v61 = vld [vmem:[%s6327_s10 + $0x10] sm:$0xff]  ;;  %v3336_v63 = vld [vmem:[%s6327_s10 + $0x20] sm:$0xff] }
 0x198   : > { %4999 = vmatprep.subr.bf16.mxu1 %v5221_v18  ;;  %4987 = vmatprep.subr.bf16.mxu0 %v5221_v18  ;;  %v5033_v62 = vpack.c.bf16 %v3335_v17, %v3334_v61 }
 0x19b   : > { %5001 = vmatpush3.bf16.msra.mxu1 %v5000_v2  ;;  %4989 = vmatpush3.bf16.msra.mxu0 %v4988_v5  ;;  %v5036_v2 = vpack.c.bf16 %v3337_v0, %v3336_v63  ;;  %v3340_v5 = vld [vmem:[%s6327_s10 + $0x40] sm:$0xff] }
 0x19c   : > { %5002 = vmatprep.subr.bf16.mxu1 %v5221_v18  ;;  %4990 = vmatprep.subr.bf16.mxu0 %v5221_v18  ;;  %v5042_v7 = vpack.c.bf16 %v3341_v6, %v3340_v5 }
 0x19f   : > { %5004 = vmatpush3.bf16.msra.mxu1 %v5003_v8  ;;  %4992 = vmatpush3.bf16.msra.mxu0 %v4991_v12  ;;  %v3342_v8 = vld [vmem:[%s6327_s10 + $0x50] sm:$0xff]  ;;  %v3344_v12 = vld [vmem:[%s6327_s10 + $0x60] sm:$0xff] }
 0x1a0   : > { %5017 = vmatprep.subr.bf16.mxu1 %v5221_v18  ;;  %5005 = vmatprep.subr.bf16.mxu0 %v5221_v18  ;;  %v5045_v11 = vpack.c.bf16 %v3343_v10, %v3342_v8  ;;  %v5048_v14 = vpack.c.bf16 %v3345_v13, %v3344_v12 }
 0x264   : > { %v2896_v16 = vpop.f32.mrb[4].mxu0  ;;  %v2977_v19 = vpop.f32.mrb[4].mxu1 }
 0x265   : > { %v2982_v21 = vmax.f32 %v2896_v16, %v2977_v19  ;;  %v4505_v22 = vpop.f32.mrb[5].mxu0  ;;  %v4526_v23 = vpop.f32.mrb[5].mxu1  ;;  %v3423_v16 = vld [vmem:[%s6329_s12] sm:$0xff]  ;;  %v3424_v19 = vld [vmem:[%s6329_s12 + $0x8] sm:$0xff] }
 0x266   : > { %v3426_v22 = vld [vmem:[%s6329_s12 + $0x18] sm:$0xff] }
 0x267   : > { %v2984_v24 = vrot.slane %v2982_v21, 1 }
 0x269   : > { %v2986_v26 = vmax.f32 %v2982_v21, %v2984_v24  ;;  %v5051_v21 = vpack.c.bf16 %v3424_v19, %v3423_v16  ;;  %v3427_v24 = vld [vmem:[%s6329_s12 + $0x20] sm:$0xff] }
 0x26b   : > { %v2988_v29 = vadd.f32 %v2987_v20, %v2986_v26  ;;  %v3004_v30 = vadd.f32 %v3002_v25, %v2986_v26  ;;  %v3425_v20 = vld [vmem:[%s6329_s12 + $0x10] sm:$0xff]  ;;  %v3428_v25 = vld [vmem:[%s6329_s12 + $0x28] sm:$0xff] }
 0x26c   : > { %v5054_v23 = vpack.c.bf16 %v3426_v22, %v3425_v20  ;;  %v5057_v26 = vpack.c.bf16 %v3428_v25, %v3427_v24 }
 0x26d   : > { %v2989_v34 = vmax.f32 %v2988_v29, 0.0  ;;  %v3005_v35 = vmax.f32 %v3004_v30, 0.0  ;;  %v5060_v29 = vpack.c.bf16 %v3430_v28, %v3429_v27 }
 0x26f   : > { %v3016_v40 = vrot.slane %v3005_v35, 2  ;;  %4563 = vmatmul.mubr.msk.f32.vlgmr.msra.gmra.mrb[6].mxu1 %vm3017_vm9, %v2989_v34  ;;  %v3255_v58 = vrot.slane %v3005_v35, 6  ;;  %v3172_v60 = vrot.slane %v3005_v35, 4 }
 0x270   : > { %5019 = vmatpush3.bf16.msra.mxu1 %v5018_v33  ;;  %4600 = vmatprep.mubr.msk.f32.mxu1 %vm5223_vm6, %v5222_v39 }
 0x271   : > { %4544 = vmatmul.mubr.msk.f32.vlgmr.msra.gmra.mrb[6].mxu0 %vm3017_vm9, %v3016_v40  ;;  %5020 = vmatprep.subr.bf16.mxu1 %v5221_v18 }
 0x272   : > { %5007 = vmatpush3.bf16.msra.mxu0 %v5006_v38  ;;  %4581 = vmatprep.mubr.msk.f32.mxu0 %vm5223_vm6, %v5222_v39 }
 0x273   : > { %5008 = vmatprep.subr.bf16.mxu0 %v5221_v18 }
 0x274   : > { %5022 = vmatpush3.bf16.msra.mxu1 %v5021_v42 }
 0x275   : > { %5023 = vmatprep.subr.bf16.mxu1 %v5221_v18 }
 0x276   : > { %5010 = vmatpush3.bf16.msra.mxu0 %v5009_v45 }
 0x277   : > { %5011 = vmatprep.subr.bf16.mxu0 %v5221_v18 }
 0x278   : > { %5025 = vmatpush3.bf16.msra.mxu1 %v5024_v48 }
 0x279   : > { %5026 = vmatprep.subr.bf16.mxu1 %v5221_v18 }
 0x27a   : > { %5013 = vmatpush3.bf16.msra.mxu0 %v5012_v51 }
 0x27b   : > { %5014 = vmatprep.subr.bf16.mxu0 %v5221_v18 }
 0x27c   : > { %5028 = vmatpush3.bf16.msra.mxu1 %v5027_v54 }
 0x27d   : > { %5050 = vmatprep.subr.bf16.mxu1 %v5221_v18 }
 0x27e   : > { %5016 = vmatpush3.bf16.msra.mxu0 %v5015_v55 }
 0x27f   : > { %4601 = vmatmul.mubr.msk.f32.vlgmr.msra.gmra.mrb[8].mxu1 %vm3017_vm9, %v3255_v58  ;;  %5029 = vmatprep.subr.bf16.mxu0 %v5221_v18 }
 0x280   : > { %4658 = vmatprep.mubr.msk.f32.mxu1 %vm5223_vm6, %v5222_v39  ;;  %5052 = vmatpush3.bf16.msra.mxu1 %v5051_v21 }
 0x281   : > { %4582 = vmatmul.mubr.msk.f32.vlgmr.msra.gmra.mrb[8].mxu0 %vm3017_vm9, %v3172_v60  ;;  %5053 = vmatprep.subr.bf16.mxu1 %v5221_v18 }
 0x282   : > { %5031 = vmatpush3.bf16.msra.mxu0 %v5030_v59  ;;  %4633 = vmatprep.mubr.msk.f32.mxu0 %vm5223_vm6, %v5222_v39 }
 0x283   : > { %5032 = vmatprep.subr.bf16.mxu0 %v5221_v18 }
 0x284   : > { %5055 = vmatpush3.bf16.msra.mxu1 %v5054_v23 }
 0x285   : > { %5056 = vmatprep.subr.bf16.mxu1 %v5221_v18 }
 0x286   : > { %5034 = vmatpush3.bf16.msra.mxu0 %v5033_v62 }
 0x287   : > { %5035 = vmatprep.subr.bf16.mxu0 %v5221_v18 }
 0x288   : > { %5058 = vmatpush3.bf16.msra.mxu1 %v5057_v26 }
 0x289   : > { %5059 = vmatprep.subr.bf16.mxu1 %v5221_v18 }
 0x28a   : > { %5037 = vmatpush3.bf16.msra.mxu0 %v5036_v2 }
 0x28b   : > { %5038 = vmatprep.subr.bf16.mxu0 %v5221_v18 }
 0x28c   : > { %5061 = vmatpush3.bf16.msra.mxu1 %v5060_v29 }
 0x28d   : > { %5062 = vmatprep.subr.bf16.mxu1 %v5221_v18 }
 0x28e   : > { %5040 = vmatpush3.bf16.msra.mxu0 %v5039_v4 }
 0x28f   : > { %5041 = vmatprep.subr.bf16.mxu0 %v5221_v18 }
 0x292   : > { %5043 = vmatpush3.bf16.msra.mxu0 %v5042_v7 }
 0x293   : > { %5044 = vmatprep.subr.bf16.mxu0 %v5221_v18 }
 0x296   : > { %5046 = vmatpush3.bf16.msra.mxu0 %v5045_v11 }
 0x297   : > { %5047 = vmatprep.subr.bf16.mxu0 %v5221_v18  ;;  %v3431_v18 = vld [vmem:[%s6329_s12 + $0x40] sm:$0xff] }
 0x298   : > { %v5063_v45 = vpack.c.bf16 %v3432_v44, %v3431_v18 }
 0x29a   : > { %5049 = vmatpush3.bf16.msra.mxu0 %v5048_v14  ;;  %5064 = vmatpush3.bf16.msra.mxu1 %v5063_v45 }
 0x29b   : > { %4631 = vmatprep.subr.mxu0 %v5222_v39  ;;  %4656 = vmatprep.subr.mxu1 %v5222_v39  ;;  %v3434_v39 = vld [vmem:[%s6330_s13] sm:$0x1] }
 0x29e   : > { %4632 = vmatpush3.msra.mxu0 %v3346_v15  ;;  %4657 = vmatpush3.msk.msra.mxu1 %vm514_vm0, %v3433_v46 }
 0x342   : > { %v3159_v30 = vpop.f32.mrb[6].mxu1 }
 0x343   : > { %v4564_v31 = vpop.f32.mrb[7].mxu1 }
 0x344   : > { %v3086_v32 = vpop.f32.mrb[6].mxu0 }
 0x345   : > { %v3160_v33 = vadd.f32 %v3159_v30, %v3086_v32  ;;  %v4545_v34 = vpop.f32.mrb[7].mxu0 }
 0x352   : > { %v3324_v35 = vpop.f32.mrb[8].mxu1 }
 0x353   : > { %v4602_v36 = vpop.f32.mrb[9].mxu1 }
 0x354   : > { %v3241_v37 = vpop.f32.mrb[8].mxu0 }
 0x355   : > { %v3245_v38 = vadd.f32 %v3241_v37, %v3160_v33  ;;  %v4583_v40 = vpop.f32.mrb[9].mxu0 }
 0x357   : > { %v3328_v41 = vadd.f32 %v3324_v35, %v3245_v38 }
 0x359   : > { %v3330_v42 = vadd.f32 %v3329_v9, %v3328_v41 }
 0x35b   : > { %v3331_v43 = vmax.f32 %v3330_v42, 0.0 }
 0x35d   : > { %4634 = vmatmul.mubr.msk.f32.vlgmr.msra.gmra.mrb[10].mxu0 %vm3348_vm10, %v3331_v43 }
 0x430   : > { %v3418_v48 = vpop.f32.mrb[10].mxu0 }
 0x431   : > { %v3419_v49 = vadd.f32 %v3418_v48, %v3347_v47  ;;  %v4635_v50 = vpop.f32.mrb[11].mxu0 }
 0x433   : > { %v3422_v51 = vmax.f32 %v3419_v49, 0.0 }
 0x435   : > { %4659 = vmatmul.mubr.msk.f32.vlgmr.msra.gmra.mrb[10].mxu1 %vm3435_vm11, %v3422_v51 }
 0x508   : > { %v3508_v52 = vpop.f32.mrb[10].mxu1 }
 0x509   : > { %v3509_v53 = vadd.f32 %v3508_v52, %v3434_v39  ;;  %v4660_v54 = vpop.f32.mrb[11].mxu1 }
 0x50b   : > { %3513 = vst.msk [vmem:[%s474_s26] sm:$0x1] %vm3512_vm12, %v3509_v53 }
 0x50c   : > { %5169 = shalt.err (!%p5166_p3)
}
 0x50d   : > { %s5170_s27 = scalar_lea.hbm %s6275_s15, 16  ;;  %s5174_s28 = scalar_lea.hbm %s6331_s14, 32 }
 0x50e   : > { %p5171_p4 = scmp.ne.s32.totalorder %s6275_s15, %s5170_s27  ;;  %p5175_p9 = scmp.lt.u32.totalorder %s6275_s15, %s6331_s14 }
 0x50f   : > { %p5176_p10 = scmp.lt.u32.totalorder %s5174_s28, %s5170_s27  ;;  %p5178_p12 = scmp.lt.u32.totalorder %s5170_s27, %s6275_s15 }
 0x510   : > { %p5172_p7 = pnand %p5171_p4, %p5338_p5 }
 0x511   : > { %p5177_p11 = por %p5176_p10, %p5175_p9 }
 0x512   : > { %p5173_p8 = pneg %p5172_p7 }
 0x513   : > { %p5179_p13 = por %p5178_p12, %p5177_p11 }
 0x515   : > { %p5180_p0 = pnand %p5179_p13, %p5173_p8 }
 0x517   : > { %5183 = shalt.err (!%p5180_p0)
}
 0x518   : > { %5113 = dma.vmem_to_hbm [thread:$0]  (%p5338_p5), %s6277_s22, 16, %s6275_s15, %s3515_s24  }
 0x519 PF: > { %p5119_p1 = scmp.ge.s32.totalorder %s5218_s16, 2  ;;  %s3539_s19 = sand.u32 1, %s5206_s29  }
 0x51a   : > { %s3540_s21 = scalar_lea.sflag [#allocation3], %s3539_s19 }
 0x51b   : > { %p5116_p2 = pnand %p5119_p1, %p5342_p6 }
 0x51d   : > { %5201 = dma.done.wait (!%p5116_p2), %s3540_s21, 16  }
 0x51e   : > { %5203 = vsyncadd (!%p5116_p2), %s3540_s21, 4294967280  ;;  %s6345_s16 = sld [smem:[#allocation6_spill]]  ;;  %s6346_s27 = sld [smem:[#allocation5_spill]] }
 0x51f   : > { %s6347_s15 = sld [smem:[#allocation7_spill]]  ;;  %s6348_s29 = smov %s5210_s30 }
 0x524   : > { %p24_p3 = scmp.ge.s32.totalorder %s6345_s16, 4   ;;  %s6349_s30 = smov %s6346_s27 }
 0x526   :  { %26 = sbr.rel (!%p24_p3) target bundleno = 3 (0x3), region = 133 }
 0x52d   :  { %3544 = vsyncpa [#allocation3], 1 }
 0x52e   :  { %3546 = vsyncpa [#allocation3 + $0x1], 1 }

</bundles_post_ra>
